<compile_context>
chip_gen: v7x
topology: tpu7x:2x2x1
jax: 0.10.0
libtpu: 0.0.40
codegen_flags: <defaults>
</compile_context>

<pallas_src>
import functools

import jax
import jax.numpy as jnp
import numpy as np
from jax.experimental import pallas as pl
from jax.experimental.pallas import tpu as pltpu


# --------------------------------------------------------------------------- #
# Fused Pallas kernel: all TemporalBlocks + Linear head, B samples per step
# --------------------------------------------------------------------------- #
def tcn_fused_kernel(x_ref, *args, cfgs, K, L, B):
    """Whole TCN forward for B samples stacked along the lane (time) axis.

    x_ref : (C_in0_p, B*L)  -- B samples side by side, compute dtype (bf16/f32)
    args  : per block  [w1 (C_out_p, K*C_in_p), b1 (C_out_p, 1),
                        w2 (C_out_p, K*C_out_p), b2 (C_out_p, 1),
                        (wd (C_out_p, C_in_p), bd (C_out_p, 1) iff downsample)]
            then lw_t (O, C_last_p), lb (O, 1), then out_ref (1, O, B).
    cfgs  : tuple of (dilation, has_downsample) per block (static).
    """
    n_block_refs = sum(6 if has_ds else 4 for (_, has_ds) in cfgs)
    block_refs = args[:n_block_refs]
    lw_ref, lb_ref, out_ref = args[n_block_refs:]

    act = x_ref[...]          # block input; stays resident in vregs/VMEM
    cdt = act.dtype           # storage / MXU-operand dtype (bf16 by default)
    BL = act.shape[1]

    # Lane-aligned zero prefix used to realize the causal left-shift of every
    # tap with plain statically-offset slices (no roll direction ambiguity,
    # aligned concat only).  pltpu.roll would do the shift in one XLU op.
    max_off = max(((K - 1) * d for (d, _) in cfgs), default=0)
    lane_pad = ((max_off + 127) // 128) * 128 if max_off > 0 else 0

    def dilated_conv(v, w_ref, b_ref, d):
        # im2col over the K taps: each tap is the input shifted right by
        # (K-1-k)*d with the first (K-1-k)*d in-sample columns zeroed (causal
        # pad; also masks the previous sample's tail in the stacked layout).
        # The K taps are stacked along (sublane-aligned) channels and fed to
        # ONE MXU matmul against the tap-folded weight, accumulating in f32.
        if lane_pad:
            vp = jnp.concatenate(
                [jnp.zeros((v.shape[0], lane_pad), v.dtype), v], axis=1)
        else:
            vp = v
        t_in_sample = jax.lax.broadcasted_iota(jnp.int32, v.shape, 1) % L
        taps = []
        for k in range(K):
            off = (K - 1 - k) * d
            tap = vp[:, lane_pad - off: lane_pad - off + BL]
            if off > 0:
                tap = jnp.where(t_in_sample >= off, tap, jnp.zeros_like(tap))
            taps.append(tap)
        stacked = jnp.concatenate(taps, axis=0) if K > 1 else taps[0]
        return jnp.dot(w_ref[...], stacked,
                       preferred_element_type=jnp.float32) + b_ref[...]

    idx = 0
    for (d, has_ds) in cfgs:
        w1, b1, w2, b2 = block_refs[idx:idx + 4]
        if has_ds:
            wd, bd = block_refs[idx + 4:idx + 6]
            idx += 6
        else:
            idx += 4

        # conv1 -> ReLU (dropout == identity at inference); elementwise in f32.
        h1 = jnp.maximum(dilated_conv(act, w1, b1, d), 0.0)

        # residual path from the unmodified block input.
        if has_ds:
            res = jnp.dot(wd[...], act,
                          preferred_element_type=jnp.float32) + bd[...]
        else:
            res = act.astype(jnp.float32)

        # conv2 -> ReLU, built straight from the in-register h1 (no staging
        # slab store/reload).
        h2 = jnp.maximum(dilated_conv(h1.astype(cdt), w2, b2, d), 0.0)

        # residual add + final ReLU; result stays resident for the next block.
        act = jnp.maximum(h2 + res, 0.0).astype(cdt)

    # Head: Linear over the last time column of every sample -> one small dot.
    # (At O=1 the (O, B) store is tiny; with larger O / B flip to a lane-dense
    # (B, O) block.)
    last_cols = jnp.concatenate(
        [act[:, b * L + L - 1: b * L + L] for b in range(B)], axis=1)  # (C, B)
    out = jnp.dot(lw_ref[...], last_cols,
                  preferred_element_type=jnp.float32) + lb_ref[...]    # (O, B)
    out_ref[0] = out.astype(out_ref.dtype)


# --------------------------------------------------------------------------- #
# Wrapper: one pallas_call for the whole network
# --------------------------------------------------------------------------- #
def tcn_forward(x, params, kernel_size, *, batch_per_step=4,
                compute_dtype=jnp.bfloat16):
    N, c_in0, L = x.shape
    K = kernel_size
    blocks = params["blocks"]
    out_size = params["linear_w"].shape[1]

    itemsize = np.dtype(compute_dtype).itemsize
    sub = 8 * (4 // itemsize)                 # sublane multiple: 8 f32 / 16 bf16

    def pad_c(c):
        return ((c + sub - 1) // sub) * sub

    B = batch_per_step
    G = pl.cdiv(N, B)
    N_pad = G * B

    # Input: (N, C_in0, L) -> channel-pad -> samples stacked along the time
    # (lane) axis: (C_in0_p, N_pad*L), cast to the compute dtype.
    c_in_p0 = pad_c(c_in0)
    x_p = jnp.zeros((N_pad, c_in_p0, L), jnp.float32).at[:N, :c_in0, :].set(x)
    x2 = jnp.transpose(x_p, (1, 0, 2)).reshape(c_in_p0, N_pad * L)
    x2 = x2.astype(compute_dtype)

    def fold_conv_weight(w, c_out_p, c_in_p):
        # (K, C_out, C_in) -> (C_out_p, K*C_in_p), tap-major columns to match
        # the im2col stacking in the kernel.  Zero padding keeps padded
        # channels exactly zero through the whole network.
        k, c_out, c_in = w.shape
        wp = jnp.zeros((k, c_out_p, c_in_p), jnp.float32)
        wp = wp.at[:, :c_out, :c_in].set(w)
        return jnp.transpose(wp, (1, 0, 2)).reshape(c_out_p, k * c_in_p)

    def pad_bias(b, c_out_p):
        return jnp.zeros((c_out_p, 1), jnp.float32).at[:b.shape[0], :].set(b)

    cfgs = []
    inputs = [x2]
    in_specs = [pl.BlockSpec((c_in_p0, B * L), lambda g: (0, g))]

    c_prev, c_prev_p = c_in0, c_in_p0
    c_max_p = c_in_p0
    for i, blk in enumerate(blocks):
        c_out = blk["w1"].shape[1]
        c_out_p = pad_c(c_out)
        c_max_p = max(c_max_p, c_out_p)
        d = 2 ** i
        has_ds = "wd" in blk                      # iff C_in != C_out (as in torch)
        cfgs.append((d, has_ds))

        w1f = fold_conv_weight(blk["w1"], c_out_p, c_prev_p).astype(compute_dtype)
        w2f = fold_conv_weight(blk["w2"], c_out_p, c_out_p).astype(compute_dtype)
        tensors = [w1f, pad_bias(blk["b1"], c_out_p),
                   w2f, pad_bias(blk["b2"], c_out_p)]
        if has_ds:
            wdp = jnp.zeros((c_out_p, c_prev_p), jnp.float32)
            wdp = wdp.at[:c_out, :c_prev].set(blk["wd"]).astype(compute_dtype)
            tensors += [wdp, pad_bias(blk["bd"], c_out_p)]
        for t in tensors:
            inputs.append(t)
            in_specs.append(pl.BlockSpec(t.shape, lambda g: (0, 0)))
        c_prev, c_prev_p = c_out, c_out_p

    c_last, c_last_p = c_prev, c_prev_p
    lw_t = jnp.zeros((out_size, c_last_p), jnp.float32)
    lw_t = lw_t.at[:, :c_last].set(params["linear_w"].T).astype(compute_dtype)
    lb_t = params["linear_b"].reshape(out_size, 1).astype(jnp.float32)
    inputs += [lw_t, lb_t]
    in_specs += [pl.BlockSpec(lw_t.shape, lambda g: (0, 0)),
                 pl.BlockSpec(lb_t.shape, lambda g: (0, 0))]

    kernel = functools.partial(tcn_fused_kernel, cfgs=tuple(cfgs),
                               K=K, L=L, B=B)

    # Explicit VMEM budget: double-buffered blocks + resident weights + a
    # generous allowance for the unrolled blocks' live f32 temporaries.
    resident = 2 * (c_in_p0 * B * L * itemsize)                   # x block
    resident += 2 * sum(int(t.size) * t.dtype.itemsize for t in inputs[1:])
    resident += 2 * (out_size * B * 4)                            # output block
    temporaries = 8 * (K * c_max_p) * (B * L) * 4
    vmem_limit = int(min(32 << 20,
                         max(16 << 20, resident + temporaries + (2 << 20))))

    out = pl.pallas_call(
        kernel,
        grid=(G,),                               # >= 2 steps keeps both v7x TCs busy
        in_specs=in_specs,
        out_specs=pl.BlockSpec((1, out_size, B), lambda g: (g, 0, 0)),
        out_shape=jax.ShapeDtypeStruct((G, out_size, B), jnp.float32),
        compiler_params=pltpu.CompilerParams(
            dimension_semantics=("parallel",),
            vmem_limit_bytes=vmem_limit),
    )(*inputs)

    y = jnp.transpose(out, (0, 2, 1)).reshape(N_pad, out_size)
    return y[:N]


# --------------------------------------------------------------------------- #
# Deterministic synthetic parameter init (shapes follow the nn.Module __init__)
# --------------------------------------------------------------------------- #
def init_params(key, input_size, output_size, num_channels, kernel_size):
    params = {"blocks": []}
    c_in = input_size
    for c_out in num_channels:
        key, k1, k2, k3, k4, k5, k6 = jax.random.split(key, 7)
        block = {
            "w1": 0.2 * jax.random.normal(k1, (kernel_size, c_out, c_in), jnp.float32),
            "b1": 0.2 * jax.random.normal(k2, (c_out, 1), jnp.float32),
            "w2": 0.2 * jax.random.normal(k3, (kernel_size, c_out, c_out), jnp.float32),
            "b2": 0.2 * jax.random.normal(k4, (c_out, 1), jnp.float32),
        }
        if c_in != c_out:  # downsample 1x1 conv only when channel counts differ
            block["wd"] = 0.2 * jax.random.normal(k5, (c_out, c_in), jnp.float32)
            block["bd"] = 0.2 * jax.random.normal(k6, (c_out, 1), jnp.float32)
        params["blocks"].append(block)
        c_in = c_out
    key, kw, kb = jax.random.split(key, 3)
    params["linear_w"] = 0.01 * jax.random.normal(kw, (c_in, output_size), jnp.float32)
    params["linear_b"] = 0.01 * jax.random.normal(kb, (1, output_size), jnp.float32)
    return params


# --------------------------------------------------------------------------- #
# Pure-JAX reference (for correctness check)
# --------------------------------------------------------------------------- #
def tcn_reference(x, params, kernel_size):
    h = x
    for i, p in enumerate(params["blocks"]):
        d = 2 ** i
        pad = (kernel_size - 1) * d

        def causal_conv(inp, w_kio, b):
            w_oik = jnp.transpose(w_kio, (1, 2, 0))      # (C_out, C_in, K)
            out = jax.lax.conv_general_dilated(
                inp, w_oik, window_strides=(1,), padding=[(pad, 0)],
                rhs_dilation=(d,), dimension_numbers=("NCH", "OIH", "NCH"),
                precision=jax.lax.Precision.HIGHEST)
            return out + b[None]

        h1 = jax.nn.relu(causal_conv(h, p["w1"], p["b1"]))
        h2 = jax.nn.relu(causal_conv(h1, p["w2"], p["b2"]))
        if "wd" in p:
            res = jnp.einsum("oc,ncl->nol", p["wd"], h,
                             precision=jax.lax.Precision.HIGHEST) + p["bd"][None]
        else:
            res = h
        h = jax.nn.relu(h2 + res)
    last = h[:, :, -1]
    return jnp.dot(last, params["linear_w"],
                   precision=jax.lax.Precision.HIGHEST) + params["linear_b"]


# --------------------------------------------------------------------------- #
if __name__ == "__main__":
    # Small shapes consistent with TCN(input_size, output_size, num_channels, k, p)
    batch = 8
    input_size = 4
    output_size = 1
    num_channels = [16, 16]       # block 0 has a downsample conv, block 1 does not
    kernel_size = 3
    seq_len = 128                 # lane-dense time axis (multiple of 128)
    batch_per_step = 4            # 4 samples / grid step -> grid of 2 (v7x: 2 TCs)

    key = jax.random.PRNGKey(0)
    key, kx = jax.random.split(key)
    x = jax.random.normal(kx, (batch, input_size, seq_len), jnp.float32)

    params = init_params(key, input_size, output_size, num_channels, kernel_size)

    y = jax.block_until_ready(
        tcn_forward(x, params, kernel_size, batch_per_step=batch_per_step,
                    compute_dtype=jnp.bfloat16))
    y_ref = jax.block_until_ready(tcn_reference(x, params, kernel_size))

    # Tolerances account for bf16 storage / f32 accumulation vs the f32
    # Precision.HIGHEST reference.
    np.testing.assert_allclose(np.asarray(y), np.asarray(y_ref),
                               rtol=5e-2, atol=5e-3)

    assert y.shape == (batch, output_size)
    print("KERNEL_OK")
</pallas_src>

<mosaic_0001>
module attributes {stable_mosaic.version = 11 : i64} {
  func.func @tcn_fused_kernel(%arg0: i32, %arg1: memref<16x512xbf16, #tpu.memory_space<vmem>>, %arg2: memref<16x48xbf16, #tpu.memory_space<vmem>>, %arg3: memref<16x1xf32, #tpu.memory_space<vmem>>, %arg4: memref<16x48xbf16, #tpu.memory_space<vmem>>, %arg5: memref<16x1xf32, #tpu.memory_space<vmem>>, %arg6: memref<16x16xbf16, #tpu.memory_space<vmem>>, %arg7: memref<16x1xf32, #tpu.memory_space<vmem>>, %arg8: memref<16x48xbf16, #tpu.memory_space<vmem>>, %arg9: memref<16x1xf32, #tpu.memory_space<vmem>>, %arg10: memref<16x48xbf16, #tpu.memory_space<vmem>>, %arg11: memref<16x1xf32, #tpu.memory_space<vmem>>, %arg12: memref<1x16xbf16, #tpu.memory_space<vmem>>, %arg13: memref<1x1xf32, #tpu.memory_space<vmem>>, %arg14: memref<1x1x4xf32, #tpu.memory_space<vmem>>) attributes {dimension_semantics = [#tpu.dimension_semantics<parallel>], iteration_bounds = array<i64: 2>, scalar_prefetch = 0 : i64, scratch_operands = 0 : i64, tpu.core_type = #tpu.core_type<tc>, window_params = [{transform_indices = @transform_0, window_bounds = array<i64: 16, 512>}, {pipeline_mode = #tpu.pipeline_mode<synchronous>, transform_indices = @transform_1, window_bounds = array<i64: 16, 48>}, {pipeline_mode = #tpu.pipeline_mode<synchronous>, transform_indices = @transform_2, window_bounds = array<i64: 16, 1>}, {pipeline_mode = #tpu.pipeline_mode<synchronous>, transform_indices = @transform_3, window_bounds = array<i64: 16, 48>}, {pipeline_mode = #tpu.pipeline_mode<synchronous>, transform_indices = @transform_4, window_bounds = array<i64: 16, 1>}, {pipeline_mode = #tpu.pipeline_mode<synchronous>, transform_indices = @transform_5, window_bounds = array<i64: 16, 16>}, {pipeline_mode = #tpu.pipeline_mode<synchronous>, transform_indices = @transform_6, window_bounds = array<i64: 16, 1>}, {pipeline_mode = #tpu.pipeline_mode<synchronous>, transform_indices = @transform_7, window_bounds = array<i64: 16, 48>}, {pipeline_mode = #tpu.pipeline_mode<synchronous>, transform_indices = @transform_8, window_bounds = array<i64: 16, 1>}, {pipeline_mode = #tpu.pipeline_mode<synchronous>, transform_indices = @transform_9, window_bounds = array<i64: 16, 48>}, {pipeline_mode = #tpu.pipeline_mode<synchronous>, transform_indices = @transform_10, window_bounds = array<i64: 16, 1>}, {pipeline_mode = #tpu.pipeline_mode<synchronous>, transform_indices = @transform_11, window_bounds = array<i64: 1, 16>}, {pipeline_mode = #tpu.pipeline_mode<synchronous>, transform_indices = @transform_12, window_bounds = array<i64: 1, 1>}, {transform_indices = @transform_13, window_bounds = array<i64: 1, 1, 4>}]} {
    %c0 = arith.constant 0 : index
    %c0_0 = arith.constant 0 : index
    %0 = vector.load %arg1[%c0, %c0_0] : memref<16x512xbf16, #tpu.memory_space<vmem>>, vector<16x512xbf16>
    %cst = arith.constant 0.000000e+00 : bf16
    %1 = vector.broadcast %cst : bf16 to vector<16x128xbf16>
    %2 = tpu.concatenate %1, %0 in 1 : vector<16x128xbf16>, vector<16x512xbf16> -> vector<16x640xbf16>
    %3 = tpu.iota {dimensions = array<i32: 1>} : vector<16x512xi32>
    %c128_i32 = arith.constant 128 : i32
    %c0_i32 = arith.constant 0 : i32
    %4 = arith.cmpi eq, %c128_i32, %c0_i32 : i32
    %c1_i32 = arith.constant 1 : i32
    %5 = arith.select %4, %c1_i32, %c128_i32 : i32
    %6 = vector.broadcast %5 : i32 to vector<16x512xi32>
    %7 = arith.remsi %3, %6 : vector<16x512xi32>
    %c0_i32_1 = arith.constant 0 : i32
    %8 = vector.broadcast %c0_i32_1 : i32 to vector<16x512xi32>
    %9 = arith.cmpi ne, %7, %8 : vector<16x512xi32>
    %c0_i32_2 = arith.constant 0 : i32
    %10 = vector.broadcast %c0_i32_2 : i32 to vector<16x512xi32>
    %11 = arith.cmpi slt, %7, %10 : vector<16x512xi32>
    %c0_i32_3 = arith.constant 0 : i32
    %12 = arith.cmpi slt, %5, %c0_i32_3 : i32
    %13 = vector.broadcast %12 : i1 to vector<16x512xi1>
    %14 = vector.broadcast %13 : vector<16x512xi1> to vector<16x512xi1>
    %15 = arith.xori %11, %14 : vector<16x512xi1>
    %16 = arith.andi %15, %9 : vector<16x512xi1>
    %17 = vector.broadcast %5 : i32 to vector<16x512xi32>
    %18 = arith.addi %7, %17 : vector<16x512xi32>
    %19 = arith.select %16, %18, %7 : vector<16x512xi1>, vector<16x512xi32>
    %20 = vector.extract_strided_slice %2 {offsets = [0, 126], sizes = [16, 512], strides = [1, 1]} : vector<16x640xbf16> to vector<16x512xbf16>
    %c2_i32 = arith.constant 2 : i32
    %21 = vector.broadcast %c2_i32 : i32 to vector<16x512xi32>
    %22 = arith.cmpi sge, %19, %21 : vector<16x512xi32>
    %cst_4 = arith.constant 0.000000e+00 : bf16
    %23 = vector.broadcast %cst_4 : bf16 to vector<16x512xbf16>
    %24 = arith.select %22, %20, %23 : vector<16x512xi1>, vector<16x512xbf16>
    %25 = vector.extract_strided_slice %2 {offsets = [0, 127], sizes = [16, 512], strides = [1, 1]} : vector<16x640xbf16> to vector<16x512xbf16>
    %c1_i32_5 = arith.constant 1 : i32
    %26 = vector.broadcast %c1_i32_5 : i32 to vector<16x512xi32>
    %27 = arith.cmpi sge, %19, %26 : vector<16x512xi32>
    %cst_6 = arith.constant 0.000000e+00 : bf16
    %28 = vector.broadcast %cst_6 : bf16 to vector<16x512xbf16>
    %29 = arith.select %27, %25, %28 : vector<16x512xi1>, vector<16x512xbf16>
    %30 = vector.extract_strided_slice %2 {offsets = [0, 128], sizes = [16, 512], strides = [1, 1]} : vector<16x640xbf16> to vector<16x512xbf16>
    %31 = tpu.concatenate %24, %29, %30 in 0 : vector<16x512xbf16>, vector<16x512xbf16>, vector<16x512xbf16> -> vector<48x512xbf16>
    %c0_7 = arith.constant 0 : index
    %c0_8 = arith.constant 0 : index
    %32 = vector.load %arg2[%c0_7, %c0_8] : memref<16x48xbf16, #tpu.memory_space<vmem>>, vector<16x48xbf16>
    %cst_9 = arith.constant dense<0.000000e+00> : vector<16x512xf32>
    %33 = tpu.matmul %32, %31, %cst_9 {dimension_numbers = #tpu.dot_dimension_numbers<[1], [0], [0], [1], [0, 0, 1, 1], [], []>} : vector<16x48xbf16>, vector<48x512xbf16>, vector<16x512xf32> -> vector<16x512xf32>
    %c0_10 = arith.constant 0 : index
    %c0_11 = arith.constant 0 : index
    %34 = vector.load %arg3[%c0_10, %c0_11] : memref<16x1xf32, #tpu.memory_space<vmem>>, vector<16x1xf32>
    %35 = vector.broadcast %34 : vector<16x1xf32> to vector<16x512xf32>
    %36 = arith.addf %33, %35 : vector<16x512xf32>
    %cst_12 = arith.constant 0.000000e+00 : f32
    %37 = vector.broadcast %cst_12 : f32 to vector<16x512xf32>
    %38 = arith.maximumf %36, %37 : vector<16x512xf32>
    %c0_13 = arith.constant 0 : index
    %c0_14 = arith.constant 0 : index
    %39 = vector.load %arg6[%c0_13, %c0_14] : memref<16x16xbf16, #tpu.memory_space<vmem>>, vector<16x16xbf16>
    %cst_15 = arith.constant dense<0.000000e+00> : vector<16x512xf32>
    %40 = tpu.matmul %39, %0, %cst_15 {dimension_numbers = #tpu.dot_dimension_numbers<[1], [0], [0], [1], [0, 0, 1, 1], [], []>} : vector<16x16xbf16>, vector<16x512xbf16>, vector<16x512xf32> -> vector<16x512xf32>
    %c0_16 = arith.constant 0 : index
    %c0_17 = arith.constant 0 : index
    %41 = vector.load %arg7[%c0_16, %c0_17] : memref<16x1xf32, #tpu.memory_space<vmem>>, vector<16x1xf32>
    %42 = vector.broadcast %41 : vector<16x1xf32> to vector<16x512xf32>
    %43 = arith.addf %40, %42 : vector<16x512xf32>
    %44 = arith.truncf %38 : vector<16x512xf32> to vector<16x512xbf16>
    %cst_18 = arith.constant 0.000000e+00 : bf16
    %45 = vector.broadcast %cst_18 : bf16 to vector<16x128xbf16>
    %46 = tpu.concatenate %45, %44 in 1 : vector<16x128xbf16>, vector<16x512xbf16> -> vector<16x640xbf16>
    %47 = tpu.iota {dimensions = array<i32: 1>} : vector<16x512xi32>
    %c128_i32_19 = arith.constant 128 : i32
    %c0_i32_20 = arith.constant 0 : i32
    %48 = arith.cmpi eq, %c128_i32_19, %c0_i32_20 : i32
    %c1_i32_21 = arith.constant 1 : i32
    %49 = arith.select %48, %c1_i32_21, %c128_i32_19 : i32
    %50 = vector.broadcast %49 : i32 to vector<16x512xi32>
    %51 = arith.remsi %47, %50 : vector<16x512xi32>
    %c0_i32_22 = arith.constant 0 : i32
    %52 = vector.broadcast %c0_i32_22 : i32 to vector<16x512xi32>
    %53 = arith.cmpi ne, %51, %52 : vector<16x512xi32>
    %c0_i32_23 = arith.constant 0 : i32
    %54 = vector.broadcast %c0_i32_23 : i32 to vector<16x512xi32>
    %55 = arith.cmpi slt, %51, %54 : vector<16x512xi32>
    %c0_i32_24 = arith.constant 0 : i32
    %56 = arith.cmpi slt, %49, %c0_i32_24 : i32
    %57 = vector.broadcast %56 : i1 to vector<16x512xi1>
    %58 = vector.broadcast %57 : vector<16x512xi1> to vector<16x512xi1>
    %59 = arith.xori %55, %58 : vector<16x512xi1>
    %60 = arith.andi %59, %53 : vector<16x512xi1>
    %61 = vector.broadcast %49 : i32 to vector<16x512xi32>
    %62 = arith.addi %51, %61 : vector<16x512xi32>
    %63 = arith.select %60, %62, %51 : vector<16x512xi1>, vector<16x512xi32>
    %64 = vector.extract_strided_slice %46 {offsets = [0, 126], sizes = [16, 512], strides = [1, 1]} : vector<16x640xbf16> to vector<16x512xbf16>
    %c2_i32_25 = arith.constant 2 : i32
    %65 = vector.broadcast %c2_i32_25 : i32 to vector<16x512xi32>
    %66 = arith.cmpi sge, %63, %65 : vector<16x512xi32>
    %cst_26 = arith.constant 0.000000e+00 : bf16
    %67 = vector.broadcast %cst_26 : bf16 to vector<16x512xbf16>
    %68 = arith.select %66, %64, %67 : vector<16x512xi1>, vector<16x512xbf16>
    %69 = vector.extract_strided_slice %46 {offsets = [0, 127], sizes = [16, 512], strides = [1, 1]} : vector<16x640xbf16> to vector<16x512xbf16>
    %c1_i32_27 = arith.constant 1 : i32
    %70 = vector.broadcast %c1_i32_27 : i32 to vector<16x512xi32>
    %71 = arith.cmpi sge, %63, %70 : vector<16x512xi32>
    %cst_28 = arith.constant 0.000000e+00 : bf16
    %72 = vector.broadcast %cst_28 : bf16 to vector<16x512xbf16>
    %73 = arith.select %71, %69, %72 : vector<16x512xi1>, vector<16x512xbf16>
    %74 = vector.extract_strided_slice %46 {offsets = [0, 128], sizes = [16, 512], strides = [1, 1]} : vector<16x640xbf16> to vector<16x512xbf16>
    %75 = tpu.concatenate %68, %73, %74 in 0 : vector<16x512xbf16>, vector<16x512xbf16>, vector<16x512xbf16> -> vector<48x512xbf16>
    %c0_29 = arith.constant 0 : index
    %c0_30 = arith.constant 0 : index
    %76 = vector.load %arg4[%c0_29, %c0_30] : memref<16x48xbf16, #tpu.memory_space<vmem>>, vector<16x48xbf16>
    %cst_31 = arith.constant dense<0.000000e+00> : vector<16x512xf32>
    %77 = tpu.matmul %76, %75, %cst_31 {dimension_numbers = #tpu.dot_dimension_numbers<[1], [0], [0], [1], [0, 0, 1, 1], [], []>} : vector<16x48xbf16>, vector<48x512xbf16>, vector<16x512xf32> -> vector<16x512xf32>
    %c0_32 = arith.constant 0 : index
    %c0_33 = arith.constant 0 : index
    %78 = vector.load %arg5[%c0_32, %c0_33] : memref<16x1xf32, #tpu.memory_space<vmem>>, vector<16x1xf32>
    %79 = vector.broadcast %78 : vector<16x1xf32> to vector<16x512xf32>
    %80 = arith.addf %77, %79 : vector<16x512xf32>
    %cst_34 = arith.constant 0.000000e+00 : f32
    %81 = vector.broadcast %cst_34 : f32 to vector<16x512xf32>
    %82 = arith.maximumf %80, %81 : vector<16x512xf32>
    %83 = arith.addf %82, %43 : vector<16x512xf32>
    %cst_35 = arith.constant 0.000000e+00 : f32
    %84 = vector.broadcast %cst_35 : f32 to vector<16x512xf32>
    %85 = arith.maximumf %83, %84 : vector<16x512xf32>
    %86 = arith.truncf %85 : vector<16x512xf32> to vector<16x512xbf16>
    %cst_36 = arith.constant 0.000000e+00 : bf16
    %87 = vector.broadcast %cst_36 : bf16 to vector<16x128xbf16>
    %88 = tpu.concatenate %87, %86 in 1 : vector<16x128xbf16>, vector<16x512xbf16> -> vector<16x640xbf16>
    %89 = tpu.iota {dimensions = array<i32: 1>} : vector<16x512xi32>
    %c128_i32_37 = arith.constant 128 : i32
    %c0_i32_38 = arith.constant 0 : i32
    %90 = arith.cmpi eq, %c128_i32_37, %c0_i32_38 : i32
    %c1_i32_39 = arith.constant 1 : i32
    %91 = arith.select %90, %c1_i32_39, %c128_i32_37 : i32
    %92 = vector.broadcast %91 : i32 to vector<16x512xi32>
    %93 = arith.remsi %89, %92 : vector<16x512xi32>
    %c0_i32_40 = arith.constant 0 : i32
    %94 = vector.broadcast %c0_i32_40 : i32 to vector<16x512xi32>
    %95 = arith.cmpi ne, %93, %94 : vector<16x512xi32>
    %c0_i32_41 = arith.constant 0 : i32
    %96 = vector.broadcast %c0_i32_41 : i32 to vector<16x512xi32>
    %97 = arith.cmpi slt, %93, %96 : vector<16x512xi32>
    %c0_i32_42 = arith.constant 0 : i32
    %98 = arith.cmpi slt, %91, %c0_i32_42 : i32
    %99 = vector.broadcast %98 : i1 to vector<16x512xi1>
    %100 = vector.broadcast %99 : vector<16x512xi1> to vector<16x512xi1>
    %101 = arith.xori %97, %100 : vector<16x512xi1>
    %102 = arith.andi %101, %95 : vector<16x512xi1>
    %103 = vector.broadcast %91 : i32 to vector<16x512xi32>
    %104 = arith.addi %93, %103 : vector<16x512xi32>
    %105 = arith.select %102, %104, %93 : vector<16x512xi1>, vector<16x512xi32>
    %106 = vector.extract_strided_slice %88 {offsets = [0, 124], sizes = [16, 512], strides = [1, 1]} : vector<16x640xbf16> to vector<16x512xbf16>
    %c4_i32 = arith.constant 4 : i32
    %107 = vector.broadcast %c4_i32 : i32 to vector<16x512xi32>
    %108 = arith.cmpi sge, %105, %107 : vector<16x512xi32>
    %cst_43 = arith.constant 0.000000e+00 : bf16
    %109 = vector.broadcast %cst_43 : bf16 to vector<16x512xbf16>
    %110 = arith.select %108, %106, %109 : vector<16x512xi1>, vector<16x512xbf16>
    %111 = vector.extract_strided_slice %88 {offsets = [0, 126], sizes = [16, 512], strides = [1, 1]} : vector<16x640xbf16> to vector<16x512xbf16>
    %c2_i32_44 = arith.constant 2 : i32
    %112 = vector.broadcast %c2_i32_44 : i32 to vector<16x512xi32>
    %113 = arith.cmpi sge, %105, %112 : vector<16x512xi32>
    %cst_45 = arith.constant 0.000000e+00 : bf16
    %114 = vector.broadcast %cst_45 : bf16 to vector<16x512xbf16>
    %115 = arith.select %113, %111, %114 : vector<16x512xi1>, vector<16x512xbf16>
    %116 = vector.extract_strided_slice %88 {offsets = [0, 128], sizes = [16, 512], strides = [1, 1]} : vector<16x640xbf16> to vector<16x512xbf16>
    %117 = tpu.concatenate %110, %115, %116 in 0 : vector<16x512xbf16>, vector<16x512xbf16>, vector<16x512xbf16> -> vector<48x512xbf16>
    %c0_46 = arith.constant 0 : index
    %c0_47 = arith.constant 0 : index
    %118 = vector.load %arg8[%c0_46, %c0_47] : memref<16x48xbf16, #tpu.memory_space<vmem>>, vector<16x48xbf16>
    %cst_48 = arith.constant dense<0.000000e+00> : vector<16x512xf32>
    %119 = tpu.matmul %118, %117, %cst_48 {dimension_numbers = #tpu.dot_dimension_numbers<[1], [0], [0], [1], [0, 0, 1, 1], [], []>} : vector<16x48xbf16>, vector<48x512xbf16>, vector<16x512xf32> -> vector<16x512xf32>
    %c0_49 = arith.constant 0 : index
    %c0_50 = arith.constant 0 : index
    %120 = vector.load %arg9[%c0_49, %c0_50] : memref<16x1xf32, #tpu.memory_space<vmem>>, vector<16x1xf32>
    %121 = vector.broadcast %120 : vector<16x1xf32> to vector<16x512xf32>
    %122 = arith.addf %119, %121 : vector<16x512xf32>
    %cst_51 = arith.constant 0.000000e+00 : f32
    %123 = vector.broadcast %cst_51 : f32 to vector<16x512xf32>
    %124 = arith.maximumf %122, %123 : vector<16x512xf32>
    %125 = arith.extf %86 : vector<16x512xbf16> to vector<16x512xf32>
    %126 = arith.truncf %124 : vector<16x512xf32> to vector<16x512xbf16>
    %cst_52 = arith.constant 0.000000e+00 : bf16
    %127 = vector.broadcast %cst_52 : bf16 to vector<16x128xbf16>
    %128 = tpu.concatenate %127, %126 in 1 : vector<16x128xbf16>, vector<16x512xbf16> -> vector<16x640xbf16>
    %129 = tpu.iota {dimensions = array<i32: 1>} : vector<16x512xi32>
    %c128_i32_53 = arith.constant 128 : i32
    %c0_i32_54 = arith.constant 0 : i32
    %130 = arith.cmpi eq, %c128_i32_53, %c0_i32_54 : i32
    %c1_i32_55 = arith.constant 1 : i32
    %131 = arith.select %130, %c1_i32_55, %c128_i32_53 : i32
    %132 = vector.broadcast %131 : i32 to vector<16x512xi32>
    %133 = arith.remsi %129, %132 : vector<16x512xi32>
    %c0_i32_56 = arith.constant 0 : i32
    %134 = vector.broadcast %c0_i32_56 : i32 to vector<16x512xi32>
    %135 = arith.cmpi ne, %133, %134 : vector<16x512xi32>
    %c0_i32_57 = arith.constant 0 : i32
    %136 = vector.broadcast %c0_i32_57 : i32 to vector<16x512xi32>
    %137 = arith.cmpi slt, %133, %136 : vector<16x512xi32>
    %c0_i32_58 = arith.constant 0 : i32
    %138 = arith.cmpi slt, %131, %c0_i32_58 : i32
    %139 = vector.broadcast %138 : i1 to vector<16x512xi1>
    %140 = vector.broadcast %139 : vector<16x512xi1> to vector<16x512xi1>
    %141 = arith.xori %137, %140 : vector<16x512xi1>
    %142 = arith.andi %141, %135 : vector<16x512xi1>
    %143 = vector.broadcast %131 : i32 to vector<16x512xi32>
    %144 = arith.addi %133, %143 : vector<16x512xi32>
    %145 = arith.select %142, %144, %133 : vector<16x512xi1>, vector<16x512xi32>
    %146 = vector.extract_strided_slice %128 {offsets = [0, 124], sizes = [16, 512], strides = [1, 1]} : vector<16x640xbf16> to vector<16x512xbf16>
    %c4_i32_59 = arith.constant 4 : i32
    %147 = vector.broadcast %c4_i32_59 : i32 to vector<16x512xi32>
    %148 = arith.cmpi sge, %145, %147 : vector<16x512xi32>
    %cst_60 = arith.constant 0.000000e+00 : bf16
    %149 = vector.broadcast %cst_60 : bf16 to vector<16x512xbf16>
    %150 = arith.select %148, %146, %149 : vector<16x512xi1>, vector<16x512xbf16>
    %151 = vector.extract_strided_slice %128 {offsets = [0, 126], sizes = [16, 512], strides = [1, 1]} : vector<16x640xbf16> to vector<16x512xbf16>
    %c2_i32_61 = arith.constant 2 : i32
    %152 = vector.broadcast %c2_i32_61 : i32 to vector<16x512xi32>
    %153 = arith.cmpi sge, %145, %152 : vector<16x512xi32>
    %cst_62 = arith.constant 0.000000e+00 : bf16
    %154 = vector.broadcast %cst_62 : bf16 to vector<16x512xbf16>
    %155 = arith.select %153, %151, %154 : vector<16x512xi1>, vector<16x512xbf16>
    %156 = vector.extract_strided_slice %128 {offsets = [0, 128], sizes = [16, 512], strides = [1, 1]} : vector<16x640xbf16> to vector<16x512xbf16>
    %157 = tpu.concatenate %150, %155, %156 in 0 : vector<16x512xbf16>, vector<16x512xbf16>, vector<16x512xbf16> -> vector<48x512xbf16>
    %c0_63 = arith.constant 0 : index
    %c0_64 = arith.constant 0 : index
    %158 = vector.load %arg10[%c0_63, %c0_64] : memref<16x48xbf16, #tpu.memory_space<vmem>>, vector<16x48xbf16>
    %cst_65 = arith.constant dense<0.000000e+00> : vector<16x512xf32>
    %159 = tpu.matmul %158, %157, %cst_65 {dimension_numbers = #tpu.dot_dimension_numbers<[1], [0], [0], [1], [0, 0, 1, 1], [], []>} : vector<16x48xbf16>, vector<48x512xbf16>, vector<16x512xf32> -> vector<16x512xf32>
    %c0_66 = arith.constant 0 : index
    %c0_67 = arith.constant 0 : index
    %160 = vector.load %arg11[%c0_66, %c0_67] : memref<16x1xf32, #tpu.memory_space<vmem>>, vector<16x1xf32>
    %161 = vector.broadcast %160 : vector<16x1xf32> to vector<16x512xf32>
    %162 = arith.addf %159, %161 : vector<16x512xf32>
    %cst_68 = arith.constant 0.000000e+00 : f32
    %163 = vector.broadcast %cst_68 : f32 to vector<16x512xf32>
    %164 = arith.maximumf %162, %163 : vector<16x512xf32>
    %165 = arith.addf %164, %125 : vector<16x512xf32>
    %cst_69 = arith.constant 0.000000e+00 : f32
    %166 = vector.broadcast %cst_69 : f32 to vector<16x512xf32>
    %167 = arith.maximumf %165, %166 : vector<16x512xf32>
    %168 = arith.truncf %167 : vector<16x512xf32> to vector<16x512xbf16>
    %169 = vector.extract_strided_slice %168 {offsets = [0, 127], sizes = [16, 1], strides = [1, 1]} : vector<16x512xbf16> to vector<16x1xbf16>
    %170 = vector.extract_strided_slice %168 {offsets = [0, 255], sizes = [16, 1], strides = [1, 1]} : vector<16x512xbf16> to vector<16x1xbf16>
    %171 = vector.extract_strided_slice %168 {offsets = [0, 383], sizes = [16, 1], strides = [1, 1]} : vector<16x512xbf16> to vector<16x1xbf16>
    %172 = vector.extract_strided_slice %168 {offsets = [0, 511], sizes = [16, 1], strides = [1, 1]} : vector<16x512xbf16> to vector<16x1xbf16>
    %173 = tpu.concatenate %169, %170, %171, %172 in 1 : vector<16x1xbf16>, vector<16x1xbf16>, vector<16x1xbf16>, vector<16x1xbf16> -> vector<16x4xbf16>
    %c0_70 = arith.constant 0 : index
    %c0_71 = arith.constant 0 : index
    %174 = vector.load %arg12[%c0_70, %c0_71] : memref<1x16xbf16, #tpu.memory_space<vmem>>, vector<1x16xbf16>
    %cst_72 = arith.constant dense<0.000000e+00> : vector<1x4xf32>
    %175 = tpu.matmul %174, %173, %cst_72 {dimension_numbers = #tpu.dot_dimension_numbers<[1], [0], [0], [1], [0, 0, 1, 1], [], []>} : vector<1x16xbf16>, vector<16x4xbf16>, vector<1x4xf32> -> vector<1x4xf32>
    %c0_73 = arith.constant 0 : index
    %c0_74 = arith.constant 0 : index
    %176 = vector.load %arg13[%c0_73, %c0_74] : memref<1x1xf32, #tpu.memory_space<vmem>>, vector<1x1xf32>
    %177 = vector.broadcast %176 : vector<1x1xf32> to vector<1x4xf32>
    %178 = arith.addf %175, %177 : vector<1x4xf32>
    %c0_75 = arith.constant 0 : index
    %c0_76 = arith.constant 0 : index
    %c0_77 = arith.constant 0 : index
    %179 = vector.load %arg14[%c0_75, %c0_76, %c0_77] : memref<1x1x4xf32, #tpu.memory_space<vmem>>, vector<1x1x4xf32>
    %180 = vector.shape_cast %179 : vector<1x1x4xf32> to vector<1x4xf32>
    %181 = vector.shape_cast %178 : vector<1x4xf32> to vector<1x1x4xf32>
    tpu.vector_store %arg14[%c0_75, %c0_76, %c0_77], %181 {strides = array<i32>} : memref<1x1x4xf32, #tpu.memory_space<vmem>>, vector<1x1x4xf32>,
    return
  }
  func.func @transform_0(%arg0: i32) -> (i32, i32) {
    %c0_i32 = arith.constant 0 : i32
    %c0_i32_0 = arith.constant 0 : i32
    return %c0_i32, %arg0 : i32, i32
  }
  func.func @transform_1(%arg0: i32) -> (i32, i32) {
    %c0_i32 = arith.constant 0 : i32
    %c0_i32_0 = arith.constant 0 : i32
    %c0_i32_1 = arith.constant 0 : i32
    return %c0_i32, %c0_i32_0 : i32, i32
  }
  func.func @transform_2(%arg0: i32) -> (i32, i32) {
    %c0_i32 = arith.constant 0 : i32
    %c0_i32_0 = arith.constant 0 : i32
    %c0_i32_1 = arith.constant 0 : i32
    return %c0_i32, %c0_i32_0 : i32, i32
  }
  func.func @transform_3(%arg0: i32) -> (i32, i32) {
    %c0_i32 = arith.constant 0 : i32
    %c0_i32_0 = arith.constant 0 : i32
    %c0_i32_1 = arith.constant 0 : i32
    return %c0_i32, %c0_i32_0 : i32, i32
  }
  func.func @transform_4(%arg0: i32) -> (i32, i32) {
    %c0_i32 = arith.constant 0 : i32
    %c0_i32_0 = arith.constant 0 : i32
    %c0_i32_1 = arith.constant 0 : i32
    return %c0_i32, %c0_i32_0 : i32, i32
  }
  func.func @transform_5(%arg0: i32) -> (i32, i32) {
    %c0_i32 = arith.constant 0 : i32
    %c0_i32_0 = arith.constant 0 : i32
    %c0_i32_1 = arith.constant 0 : i32
    return %c0_i32, %c0_i32_0 : i32, i32
  }
  func.func @transform_6(%arg0: i32) -> (i32, i32) {
    %c0_i32 = arith.constant 0 : i32
    %c0_i32_0 = arith.constant 0 : i32
    %c0_i32_1 = arith.constant 0 : i32
    return %c0_i32, %c0_i32_0 : i32, i32
  }
  func.func @transform_7(%arg0: i32) -> (i32, i32) {
    %c0_i32 = arith.constant 0 : i32
    %c0_i32_0 = arith.constant 0 : i32
    %c0_i32_1 = arith.constant 0 : i32
    return %c0_i32, %c0_i32_0 : i32, i32
  }
  func.func @transform_8(%arg0: i32) -> (i32, i32) {
    %c0_i32 = arith.constant 0 : i32
    %c0_i32_0 = arith.constant 0 : i32
    %c0_i32_1 = arith.constant 0 : i32
    return %c0_i32, %c0_i32_0 : i32, i32
  }
  func.func @transform_9(%arg0: i32) -> (i32, i32) {
    %c0_i32 = arith.constant 0 : i32
    %c0_i32_0 = arith.constant 0 : i32
    %c0_i32_1 = arith.constant 0 : i32
    return %c0_i32, %c0_i32_0 : i32, i32
  }
  func.func @transform_10(%arg0: i32) -> (i32, i32) {
    %c0_i32 = arith.constant 0 : i32
    %c0_i32_0 = arith.constant 0 : i32
    %c0_i32_1 = arith.constant 0 : i32
    return %c0_i32, %c0_i32_0 : i32, i32
  }
  func.func @transform_11(%arg0: i32) -> (i32, i32) {
    %c0_i32 = arith.constant 0 : i32
    %c0_i32_0 = arith.constant 0 : i32
    %c0_i32_1 = arith.constant 0 : i32
    return %c0_i32, %c0_i32_0 : i32, i32
  }
  func.func @transform_12(%arg0: i32) -> (i32, i32) {
    %c0_i32 = arith.constant 0 : i32
    %c0_i32_0 = arith.constant 0 : i32
    %c0_i32_1 = arith.constant 0 : i32
    return %c0_i32, %c0_i32_0 : i32, i32
  }
  func.func @transform_13(%arg0: i32) -> (i32, i32, i32) {
    %c0_i32 = arith.constant 0 : i32
    %c0_i32_0 = arith.constant 0 : i32
    %c0_i32_1 = arith.constant 0 : i32
    return %arg0, %c0_i32, %c0_i32_0 : i32, i32, i32
  }
}

</mosaic_0001>

<bundles_post_ra>
// kernel: tpu_custom_call.1
= control target key start
LH: loop header
LB: loop body
LE: loop exit
PB: predicated region body
PF: predicated region fallthrough
CT: control target
= control target key end

     0   :  { %s2711_s0 = inlined_call_operand.vmem [shape: bf16[16,1024], index: 0, kind: input, shape index: {}]   ;;  %s2712_s1 = inlined_call_operand.vmem [shape: bf16[16,48], index: 1, kind: input, shape index: {}]   ;;  %s2713_s2 = inlined_call_operand.vmem [shape: f32[16,1], index: 2, kind: input, shape index: {}]   ;;  %s2714_s3 = inlined_call_operand.vmem [shape: bf16[16,48], index: 3, kind: input, shape index: {}]   ;;  %s2715_s4 = inlined_call_operand.vmem [shape: f32[16,1], index: 4, kind: input, shape index: {}]   ;;  %s2716_s5 = inlined_call_operand.vmem [shape: bf16[16,16], index: 5, kind: input, shape index: {}]   ;;  %s2717_s6 = inlined_call_operand.vmem [shape: f32[16,1], index: 6, kind: input, shape index: {}]   ;;  %s2718_s7 = inlined_call_operand.vmem [shape: bf16[16,48], index: 7, kind: input, shape index: {}]   ;;  %s2719_s8 = inlined_call_operand.vmem [shape: f32[16,1], index: 8, kind: input, shape index: {}]   ;;  %s2720_s9 = inlined_call_operand.vmem [shape: bf16[16,48], index: 9, kind: input, shape index: {}]   ;;  %s2721_s10 = inlined_call_operand.vmem [shape: f32[16,1], index: 10, kind: input, shape index: {}]   ;;  %s2722_s11 = inlined_call_operand.vmem [shape: bf16[1,16], index: 11, kind: input, shape index: {}]   ;;  %s2723_s12 = inlined_call_operand.<no memory space> [shape: f32[1,1], index: 12, kind: input, shape index: {}]   ;;  %s2724_s13 = inlined_call_operand.hbm [shape: f32[2,1,4], index: 13, kind: output, shape index: {}]  }
   0x1   :  { %2725 = sst [smem:[#allocation7_spill]] %s2711_s0  ;;  %v18_v0 = vstv %s2723_s12 }
   0x2   :  { %19 = vst [vmem:[#allocation2] sm:$0x1] %v18_v0 }
   0x3   :  { %20 = vsyncpa [#allocation5], 0 }
   0x4   :  { %22 = vsyncpa [#allocation5 + $0x1], 0  ;;  %s2087_s27 = smov 0   ;;  %s2089_s28 = smov 0  }
   0x5   :  { %s2091_s29 = smov 0   ;;  %s2093_s30 = smov 0  }
   0x6 LB: > { %s1836_s12 = sadd.s32 4294967295, %s2001_s30   ;;  %s1837_s14 = sadd.s32 4294967294, %s2001_s30   ;;  %s2001_s30 = sphi %s2093_s30, %s2732_s30   ;;  %s1997_s29 = sphi %s2091_s29, %s2731_s29   ;;  %s1993_s28 = sphi %s2089_s28, %s2730_s28   ;;  %s1989_s27 = sphi %s2087_s27, %s2729_s27  }
   0x7   : > { %s2110_s15 = sadd.s32 1, %s2001_s30   ;;  %s35_s16 = sadd.s32 1, %s1997_s29 }
   0x8   : > { %s32_s17 = ssub.s32 %s2001_s30, %s2110_s15  ;;  %p42_p0 = scmp.ne.s32.totalorder %s1997_s29, %s1993_s28 }
   0x9   : > { %p33_p1 = scmp.eq.s32.totalorder %s32_s17, 0  ;;  %p43_p2 = scmp.eq.s32.totalorder %s2001_s30, 0 }
   0xa   : > { %p324_p3 = scmp.eq.s32.totalorder %s1836_s12, 1  ;;  %p329_p4 = scmp.ne.s32.totalorder %s1993_s28, %s1989_s27 }
   0xb   : > { %s2123_s18 = scalar_select %p33_p1, %s1997_s29, %s35_s16  }
   0xc   : > { %p44_p5 = por %p43_p2, %p42_p0  ;;  %p2125_p6 = por %p324_p3, %p42_p0 }
   0xd   : > { %p330_p7 = scmp.eq.s32.totalorder %s1837_s14, 1  ;;  %p1839_p9 = scmp.ge.s32.totalorder %s2001_s30, 2 }
   0xf   : > { %p2129_p8 = por %p330_p7, %p329_p4  ;;  %382 = sbr.rel (%p1839_p9) target bundleno = 34 (0x22), region = 64 }
  0x16   : > { %385 = sbr.rel (!%p44_p5) target bundleno = 34 (0x22), region = 68  ;;  %s387_s21 = sand.u32 (%p44_p5), 1, %s1997_s29  }
  0x17   : > { %s1868_s22 = sshll.u32 (%p44_p5), %s2001_s30, 4  ;;  %s1840_s23 = sshll.u32 (%p44_p5), %s387_s21, 5 }
  0x18   : > { %s2728_s0 = sld [smem:[#allocation7_spill]] (%p44_p5)  ;;  %s389_s14 = scalar_lea.vmem (%p44_p5), [#allocation3], %s1840_s23 }
  0x1e   : > { %s392_s26 = scalar_lea.vmem %s2728_s0, %s1868_s22 }
  0x1f   : > { %v405_v1 = vld [vmem:[%s392_s26] sm:$0xff]  ;;  %v407_v2 = vld [vmem:[%s392_s26 + $0x8] sm:$0xff] }
  0x20   : > { %v409_v3 = vld [vmem:[%s392_s26 + $0x20] sm:$0xff]  ;;  %406 = vst [vmem:[%s389_s14] sm:$0xff] %v405_v1  ;;  %408 = vst [vmem:[%s389_s14 + $0x8] sm:$0xff] %v407_v2  ;;  %v411_v4 = vld [vmem:[%s392_s26 + $0x28] sm:$0xff] }
  0x21   : > { %410 = vst [vmem:[%s389_s14 + $0x10] sm:$0xff] %v409_v3  ;;  %412 = vst [vmem:[%s389_s14 + $0x18] sm:$0xff] %v411_v4 }
  0x22 PF: > { %p1843_p10 = scmp.ge.s32.totalorder %s2001_s30, 1  ;;  %p417_p11 = scmp.lt.s32.totalorder %s2001_s30, 3 }
  0x24   : > { %p418_p12 = pnand %p1843_p10, %p417_p11 }
  0x25   : > { %v494_v5 = vlaneseq (!%p418_p12)  ;;  %s2144_s16 = sand.u32 (!%p418_p12), 1, %s1993_s28   ;;  %v2003_v6 = vmov (!%p418_p12), 0   ;;  %s2004_s22 = smov (!%p418_p12), 127   ;;  %vm623_vm12 = vcmask (!%p418_p12), 1039360  }
  0x26   : > { %421 = sbr.rel (%p418_p12) target bundleno = 2443 (0x98b), region = 91  ;;  %779 = vmatprep.mubr.bf16.mxu0 (!%p418_p12), %v2003_v6  ;;  %822 = vmatprep.mubr.bf16.mxu1 (!%p418_p12), %v2003_v6  ;;  %s1844_s17 = sshll.u32 (!%p418_p12), %s2144_s16, 5 }
  0x27   : > { %v2148_v7 = vand.u32 (!%p418_p12), 127, %v494_v5  ;;  %1926 = vset.pattern.permute.xlu0 (!%p418_p12), %v2003_v6  ;;  %1927 = vset.pattern.permute.xlu1 (!%p418_p12), %v2003_v6  ;;  %v556_v8 = vshrl.u32 (!%p418_p12), %v494_v5, 7  ;;  %s2155_s21 = scalar_lea.vmem (!%p418_p12), [#allocation3], %s1844_s17  ;;  %s2005_s23 = smov (!%p418_p12), 126  }
  0x28   : > { %v2199_v29 = vld [vmem:[%s2155_s21] ss:$16 sps:$4 sm:$0xff] (!%p418_p12)   ;;  %v2204_v32 = vld [vmem:[%s2155_s21 + $0xc] ss:$16 sps:$4 sm:$0xff] (!%p418_p12)   ;;  %v2209_v34 = vld [vmem:[%s2155_s21 + $0x4] ss:$16 sps:$4 sm:$0xff] (!%p418_p12)  }
  0x29   : > { %v497_v9 = vadd.s32 (!%p418_p12), 256, %v2148_v7  ;;  %v498_v10 = vadd.s32 (!%p418_p12), 384, %v2148_v7  ;;  %v496_v11 = vadd.s32 (!%p418_p12), 128, %v2148_v7  ;;  %v2162_v14 = vsub.s32 (!%p418_p12), 0, %v556_v8  ;;  %v2236_v43 = vld [vmem:[%s2155_s21 + $0x8] ss:$16 sps:$4 sm:$0xff] (!%p418_p12)  }
  0x2a   : > { %vm591_vm0 = vcmp.ge.s32.totalorder (!%p418_p12), %v2148_v7, 1  ;;  %v2167_v16 = vsub.s32 (!%p418_p12), 4, %v556_v8  ;;  %vm547_vm3 = vcmp.ge.s32.totalorder (!%p418_p12), %v2148_v7, 2  ;;  %s2006_s24 = smov (!%p418_p12), 2   ;;  %v668_v8 = vld [vmem:[%s2713_s2 + $0x8] sm:$0xff] (!%p418_p12)  ;;  %s2007_s21 = smov (!%p418_p12), 124  }
  0x2b   : > { %v2158_v12 = vand.u32 (!%p418_p12), 127, %v497_v9  ;;  %v2160_v13 = vand.u32 (!%p418_p12), 127, %v498_v10  ;;  %v2164_v15 = vand.u32 (!%p418_p12), 127, %v496_v11  ;;  %v667_v10 = vld [vmem:[%s2713_s2] sm:$0xff] (!%p418_p12)  ;;  %s2008_s14 = smov (!%p418_p12), 4   ;;  %s465_s26 = scalar_lea.vmem (!%p418_p12), [#allocation4], %s2144_s16 }
  0x2c   : > { %s2013_s25 = smov (!%p418_p12), [#allocation4]  }
  0x2d   : > { %vm593_vm1 = vcmp.ge.s32.totalorder %v2158_v12, 1  ;;  %vm594_vm2 = vcmp.ge.s32.totalorder %v2160_v13, 1  ;;  %vm592_vm5 = vcmp.ge.s32.totalorder %v2164_v15, 1  ;;  %vm548_vm6 = vcmp.ge.s32.totalorder %v2164_v15, 2  ;;  %s1943_s0 = sshll.u32 %s2013_s25, 4  ;;  %s1944_s0 = int_to_ptr.vmem [resolvable:$false] %s1943_s0 }
  0x2e   : > { %vm596_vm4 = vmpackc.low %vm594_vm2, %vm593_vm1  ;;  %vm549_vm9 = vcmp.ge.s32.totalorder %v2158_v12, 2  ;;  %vm550_vm10 = vcmp.ge.s32.totalorder %v2160_v13, 2  ;;  %vm579_vm2 = vcmask 1031168   ;;  %s1945_s17 = scalar_lea.vmem %s1944_s0, 32 }
  0x2f   : > { %v598_v17 = vsel %vm596_vm4, 65537, %v2003_v6  ;;  %vm595_vm7 = vmpackc.low %vm592_vm5, %vm591_vm0 }
  0x30   : > { %v610_v18 = vrot.slane %v598_v17, %v2162_v14  ;;  %v597_v19 = vsel %vm595_vm7, 65537, %v2003_v6  ;;  %vm551_vm8 = vmpackc.low %vm548_vm6, %vm547_vm3  ;;  %v614_v21 = vrot.slane %v598_v17, %v2167_v16  ;;  %vm718_vm6 = vcmask 15360  }
  0x31   : > { %v602_v20 = vrot.slane %v597_v19, %v2162_v14  ;;  %v606_v22 = vrot.slane %v597_v19, %v2167_v16  ;;  %v553_v23 = vsel %vm551_vm8, 65537, %v2003_v6  ;;  %vm552_vm11 = vmpackc.low %vm550_vm10, %vm549_vm9  ;;  %vm743_vm7 = vcmask 392192  }
  0x32   : > { %619 = vrot.lane.b32.xlu1 %v610_v18, %s2004_s22  ;;  %v562_v24 = vrot.slane %v553_v23, %v2167_v16  ;;  %v558_v25 = vrot.slane %v553_v23, %v2162_v14  ;;  %v554_v26 = vsel %vm552_vm11, 65537, %v2003_v6  ;;  %vm860_vm8 = vcmask 130048  }
  0x33   : > { %615 = vrot.lane.b32.xlu0 %v602_v20, %s2004_s22  ;;  %v570_v27 = vrot.slane %v554_v26, %v2167_v16  ;;  %v566_v28 = vrot.slane %v554_v26, %v2162_v14  ;;  %vm1185_vm9 = vcmp.ge.s32.totalorder %v2148_v7, 4  ;;  %vm1186_vm10 = vcmp.ge.s32.totalorder %v2164_v15, 4 }
  0x34   : > { %vm1187_vm11 = vcmp.ge.s32.totalorder %v2158_v12, 4 }
  0x36   : > { %621 = vrot.lane.b32.xlu1 %v614_v21, %s2004_s22 }
  0x37   : > { %617 = vrot.lane.b32.xlu0 %v606_v22, %s2004_s22 }
  0x3a   : > { %573 = vrot.lane.b32.xlu1 %v562_v24, %s2005_s23 }
  0x3b   : > { %571 = vrot.lane.b32.xlu0 %v558_v25, %s2005_s23 }
  0x3e   : > { %577 = vrot.lane.b32.xlu1 %v570_v27, %s2005_s23 }
  0x3f   : > { %575 = vrot.lane.b32.xlu0 %v566_v28, %s2005_s23 }
  0x42   : > { %640 = vrot.lane.b32.xlu1 %v2003_v6, %s2004_s22 }
  0x46   : > { %654 = vrot.lane.b32.xlu1 %v2199_v29, %s2005_s23 }
  0xa4   : > { %v620_v30 = vpop.permute.xlu1 %619 }
  0xa5   : > { %v616_v31 = vpop.permute.xlu0 %615 }
  0xa8   : > { %v2206_v33 = vpop.permute.xlu1 %621 }
  0xa9   : > { %v618_v35 = vpop.permute.xlu0 %617  ;;  %vm630_vm13 = vcmp.ne.s16.totalorder %v2206_v33, 0  ;;  %v2229_v40 = vsel %vm623_vm12, %v620_v30, %v2206_v33 }
  0xaa   : > { %v634_v36 = vsel %vm630_vm13, %v2204_v32, 0  ;;  %v2216_v37 = vsel %vm623_vm12, %v618_v35, %v620_v30  ;;  %v2219_v38 = vsel %vm623_vm12, %v616_v31, %v618_v35  ;;  %vm629_vm0 = vcmp.ne.s16.totalorder %v2229_v40, 0 }
  0xab   : > { %648 = vrot.lane.b32.xlu0 %v634_v36, %s2004_s22  ;;  %vm628_vm14 = vcmp.ne.s16.totalorder %v2216_v37, 0  ;;  %vm627_vm15 = vcmp.ne.s16.totalorder %v2219_v38, 0  ;;  %v633_v44 = vsel %vm629_vm0, %v2236_v43, 0 }
  0xac   : > { %v632_v39 = vsel %vm628_vm14, %v2209_v34, 0  ;;  %v574_v41 = vpop.permute.xlu1 %573  ;;  %v631_v42 = vsel %vm627_vm15, %v2199_v29, 0 }
  0xad   : > { %644 = vrot.lane.b32.xlu1 %v632_v39, %s2004_s22  ;;  %v572_v47 = vpop.permute.xlu0 %571 }
  0xae   : > { %v2270_v60 = vsel %vm579_vm2, %v572_v47, %v574_v41 }
  0xaf   : > { %642 = vrot.lane.b32.xlu0 %v631_v42, %s2004_s22  ;;  %vm583_vm4 = vcmp.ne.s16.totalorder %v2270_v60, 0 }
  0xb0   : > { %v2245_v45 = vpop.permute.xlu1 %577  ;;  %v587_v0 = vsel %vm583_vm4, %v2199_v29, 0 }
  0xb1   : > { %658 = vrot.lane.b32.xlu1 %v2236_v43, %s2005_s23  ;;  %vm586_vm1 = vcmp.ne.s16.totalorder %v2245_v45, 0  ;;  %v576_v49 = vpop.permute.xlu0 %575 }
  0xb2   : > { %v590_v46 = vsel %vm586_vm1, %v2204_v32, 0  ;;  %v2262_v56 = vsel %vm579_vm2, %v574_v41, %v576_v49  ;;  %v2274_v61 = vsel %vm579_vm2, %v576_v49, %v2245_v45 }
  0xb3   : > { %646 = vrot.lane.b32.xlu0 %v633_v44, %s2004_s22  ;;  %vm584_vm3 = vcmp.ne.s16.totalorder %v2262_v56, 0  ;;  %vm585_vm5 = vcmp.ne.s16.totalorder %v2274_v61, 0 }
  0xb4   : > { %v2259_v48 = vpop.permute.xlu1 %640  ;;  %v588_v62 = vsel %vm584_vm3, %v2209_v34, 0  ;;  %v589_v63 = vsel %vm585_vm5, %v2236_v43, 0 }
  0xb5   : > { %688 = vrot.lane.b32.xlu1 %v2003_v6, %s2006_s24 }
  0xb7   : > { %656 = vrot.lane.b32.xlu0 %v2209_v34, %s2005_s23 }
  0xb8   : > { %v655_v50 = vpop.permute.xlu1 %654 }
  0xb9   : > { %696 = vrot.lane.b32.xlu1 %v590_v46, %s2006_s24 }
  0xbb   : > { %660 = vrot.lane.b32.xlu0 %v2204_v32, %s2005_s23 }
 0x11d   : > { %v649_v51 = vpop.permute.xlu0 %648 }
 0x11f   : > { %v645_v53 = vpop.permute.xlu1 %644 }
 0x121   : > { %v643_v52 = vpop.permute.xlu0 %642 }
 0x122   : > { %v651_v2 = vsel %vm623_vm12, %v643_v52, %v645_v53  ;;  %v650_v5 = vsel %vm623_vm12, %v2259_v48, %v643_v52 }
 0x123   : > { %v659_v55 = vpop.permute.xlu1 %658 }
 0x125   : > { %v647_v54 = vpop.permute.xlu0 %646 }
 0x126   : > { %v652_v1 = vsel %vm623_vm12, %v645_v53, %v647_v54  ;;  %v653_v3 = vsel %vm623_vm12, %v647_v54, %v649_v51  ;;  %v1934_v53 = vld [vmem:[%s2712_s1] sm:$0xff]  }
 0x127   : > { %v2310_v11 = vpop.permute.xlu1 %688  ;;  %v1935_v54 = vld [vmem:[%s2716_s5] sm:$0xff]  }
 0x129   : > { %v657_v57 = vpop.permute.xlu0 %656 }
 0x12a   : > { %v663_v58 = vsel %vm579_vm2, %v657_v57, %v659_v55  ;;  %v662_v59 = vsel %vm579_vm2, %v655_v50, %v657_v57 }
 0x12b   : > { %712 = vrot.lane.b32.xlu0 %v663_v58, %s2006_s24  ;;  %710 = vrot.lane.b32.xlu1 %v662_v59, %s2006_s24  ;;  %v697_v17 = vpop.permute.xlu1 %696 }
 0x12d   : > { %v661_v4 = vpop.permute.xlu0 %660 }
 0x12e   : > { %v664_v9 = vsel %vm579_vm2, %v659_v55, %v661_v4 }
 0x12f   : > { %692 = vrot.lane.b32.xlu0 %v588_v62, %s2006_s24  ;;  %708 = vrot.lane.b32.xlu1 %v655_v50, %s2006_s24 }
 0x133   : > { %694 = vrot.lane.b32.xlu0 %v589_v63, %s2006_s24  ;;  %690 = vrot.lane.b32.xlu1 %v587_v0, %s2006_s24 }
 0x137   : > { %706 = vrot.lane.b32.xlu0 %v649_v51, %s2006_s24  ;;  %702 = vrot.lane.b32.xlu1 %v652_v1, %s2006_s24 }
 0x13b   : > { %700 = vrot.lane.b32.xlu0 %v651_v2, %s2006_s24  ;;  %704 = vrot.lane.b32.xlu1 %v653_v3, %s2006_s24 }
 0x13f   : > { %698 = vrot.lane.b32.xlu0 %v650_v5, %s2006_s24  ;;  %716 = vrot.lane.b32.xlu1 %v661_v4, %s2006_s24 }
 0x143   : > { %714 = vrot.lane.b32.xlu0 %v664_v9, %s2006_s24  ;;  %676 = vperm.xlu1 %1927, %v668_v8  }
 0x147   : > { %671 = vperm.xlu0 %1926, %v667_v10  }
 0x19d   : > { %v711_v18 = vpop.permute.xlu1 %710  ;;  %v713_v19 = vpop.permute.xlu0 %712 }
 0x19e   : > { %v728_v46 = vsel %vm718_vm6, %v711_v18, %v713_v19 }
 0x1a1   : > { %v709_v20 = vpop.permute.xlu1 %708  ;;  %v693_v21 = vpop.permute.xlu0 %692 }
 0x1a2   : > { %v727_v50 = vsel %vm718_vm6, %v709_v20, %v711_v18 }
 0x1a5   : > { %v695_v22 = vpop.permute.xlu0 %694  ;;  %v691_v23 = vpop.permute.xlu1 %690 }
 0x1a6   : > { %v720_v24 = vsel %vm718_vm6, %v691_v23, %v693_v21  ;;  %v722_v25 = vsel %vm718_vm6, %v695_v22, %v697_v17  ;;  %v719_v26 = vsel %vm718_vm6, %v2310_v11, %v691_v23  ;;  %v721_v27 = vsel %vm718_vm6, %v693_v21, %v695_v22 }
 0x1a7   : > { %747 = vmatprep.subr.bf16.mxu0 %v720_v24  ;;  %790 = vmatprep.subr.bf16.mxu1 %v722_v25 }
 0x1a8   : > { %748 = vmatpush1.bf16.msra.mxu0 %v719_v26  ;;  %791 = vmatpush1.bf16.msra.mxu1 %v721_v27 }
 0x1a9   : > { %v707_v28 = vpop.permute.xlu0 %706  ;;  %v703_v30 = vpop.permute.xlu1 %702 }
 0x1ad   : > { %v701_v31 = vpop.permute.xlu0 %700  ;;  %v705_v35 = vpop.permute.xlu1 %704 }
 0x1ae   : > { %v724_v36 = vsel %vm718_vm6, %v701_v31, %v703_v30  ;;  %v726_v39 = vsel %vm718_vm6, %v705_v35, %v707_v28  ;;  %v725_v41 = vsel %vm718_vm6, %v703_v30, %v705_v35 }
 0x1af   : > { %749 = vmatprep.subr.bf16.mxu0 %v724_v36  ;;  %792 = vmatprep.subr.bf16.mxu1 %v726_v39 }
 0x1b0   : > { %793 = vmatpush1.bf16.msra.mxu1 %v725_v41 }
 0x1b1   : > { %v699_v42 = vpop.permute.xlu0 %698  ;;  %v717_v47 = vpop.permute.xlu1 %716 }
 0x1b2   : > { %v723_v44 = vsel %vm718_vm6, %v699_v42, %v701_v31 }
 0x1b3   : > { %750 = vmatpush1.bf16.msra.mxu0 %v723_v44 }
 0x1b4   : > { %751 = vmatprep.subr.bf16.mxu0 %v728_v46 }
 0x1b5   : > { %v715_v49 = vpop.permute.xlu0 %714 }
 0x1b6   : > { %v730_v51 = vsel %vm718_vm6, %v715_v49, %v717_v47  ;;  %v729_v52 = vsel %vm718_vm6, %v713_v19, %v715_v49 }
 0x1b7   : > { %752 = vmatpush1.bf16.msra.mxu0 %v727_v50  ;;  %794 = vmatprep.subr.bf16.mxu1 %v730_v51 }
 0x1b8   : > { %795 = vmatpush1.bf16.msra.mxu1 %v729_v52  ;;  %864 = vmatprep.subr.bf16.mxu0 %v2209_v34 }
 0x1b9   : > { %907 = vmatprep.subr.bf16.mxu1 %v2204_v32 }
 0x1ba   : > { %1850 = vmatmul.mubr.msk.bf16.vlgmr.msra.gmra.mrb[0].mxu0 %vm743_vm7, %v1934_v53 }
 0x1bb   : > { %1851 = vmatmul.mubr.msk.bf16.vlgmr.msra.gmra.mrb[0].mxu1 %vm743_vm7, %v1934_v53  ;;  %865 = vmatpush1.bf16.msra.mxu0 %v2199_v29 }
 0x1bc   : > { %908 = vmatpush1.bf16.msra.mxu1 %v2236_v43  ;;  %896 = vmatprep.mubr.bf16.mxu0 %v2003_v6 }
 0x1bd   : > { %939 = vmatprep.mubr.bf16.mxu1 %v2003_v6 }
 0x1c2   : > { %1853 = vmatmul.mubr.msk.bf16.vlgmr.msra.gmra.mrb[4].mxu0 %vm860_vm8, %v1935_v54  ;;  %v677_v34 = vpop.permute.xlu1 %676 }
 0x1c3   : > { %1854 = vmatmul.mubr.msk.bf16.vlgmr.msra.gmra.mrb[4].mxu1 %vm860_vm8, %v1935_v54  ;;  %1103 = vmatprep.mubr.bf16.mxu0 %v2003_v6 }
 0x1c4   : > { %1146 = vmatprep.mubr.bf16.mxu1 %v2003_v6 }
 0x1c6   : > { %v672_v29 = vpop.permute.xlu0 %671 }
 0x28d   : > { %v781_v32 = vpop.f32.mrb[0].mxu0 }
 0x28e   : > { %v782_v43 = vadd.f32 %v781_v32, %v672_v29  ;;  %v783_v55 = vpop.f32.mrb[1].mxu0  ;;  %v824_v57 = vpop.f32.mrb[0].mxu1 }
 0x28f   : > { %v784_v58 = vadd.f32 %v783_v55, %v672_v29  ;;  %v825_v59 = vadd.f32 %v824_v57, %v672_v29  ;;  %v785_v62 = vpop.f32.mrb[2].mxu0  ;;  %v826_v63 = vpop.f32.mrb[1].mxu1  ;;  %v996_v57 = vld [vmem:[%s2715_s4 + $0x8] sm:$0xff] }
 0x290   : > { %v827_v0 = vadd.f32 %v826_v63, %v672_v29  ;;  %v786_v1 = vadd.f32 %v785_v62, %v677_v34  ;;  %v787_v2 = vpop.f32.mrb[3].mxu0  ;;  %v828_v3 = vpop.f32.mrb[2].mxu1  ;;  %v833_v10 = vmax.f32 %v782_v43, 0.0 }
 0x291   : > { %v835_v4 = vmax.f32 %v825_v59, 0.0  ;;  %v788_v5 = vadd.f32 %v787_v2, %v677_v34  ;;  %v829_v8 = vadd.f32 %v828_v3, %v677_v34  ;;  %v830_v9 = vpop.f32.mrb[3].mxu1  ;;  %v834_v19 = vmax.f32 %v784_v58, 0.0 }
 0x292   : > { %v831_v17 = vadd.f32 %v830_v9, %v677_v34  ;;  %v837_v18 = vmax.f32 %v786_v1, 0.0  ;;  %v836_v22 = vmax.f32 %v827_v0, 0.0  ;;  %v995_v1 = vld [vmem:[%s2715_s4] sm:$0xff] }
 0x293   : > { %v838_v20 = vmax.f32 %v788_v5, 0.0  ;;  %v839_v21 = vmax.f32 %v829_v8, 0.0 }
 0x294   : > { %v840_v23 = vmax.f32 %v831_v17, 0.0  ;;  %v950_v24 = vpack.c.bf16 %v837_v18, %v833_v10  ;;  %v843_v17 = vld [vmem:[%s2717_s6] sm:$0xff] }
 0x295   : > { %v951_v25 = vpack.c.bf16 %v838_v20, %v834_v19  ;;  %v952_v26 = vpack.c.bf16 %v839_v21, %v835_v4  ;;  %v2396_v63 = vpop.f32.mrb[4].mxu0  ;;  %v844_v4 = vld [vmem:[%s2717_s6 + $0x8] sm:$0xff] }
 0x296   : > { %v953_v27 = vpack.c.bf16 %v840_v23, %v836_v22  ;;  %982 = vrot.lane.b32.xlu1 %v950_v24, %s2005_s23  ;;  %v958_v28 = vsel %vm627_vm15, %v950_v24, 0  ;;  %v954_v37 = vsel %vm583_vm4, %v950_v24, 0  ;;  %v2398_v0 = vpop.f32.mrb[4].mxu1  ;;  %v2404_v2 = vpop.f32.mrb[5].mxu0  ;;  %vm1217_vm15 = vcmask 1014784  }
 0x297   : > { %984 = vrot.lane.b32.xlu0 %v951_v25, %s2005_s23  ;;  %v959_v30 = vsel %vm628_vm14, %v951_v25, 0  ;;  %v960_v31 = vsel %vm629_vm0, %v952_v26, 0  ;;  %v955_v38 = vsel %vm584_vm3, %v951_v25, 0  ;;  %v956_v33 = vsel %vm585_vm5, %v952_v26, 0  ;;  %v2406_v3 = vpop.f32.mrb[5].mxu1  ;;  %v2411_v5 = vpop.f32.mrb[6].mxu0 }
 0x298   : > { %v961_v35 = vsel %vm630_vm13, %v953_v27, 0  ;;  %v957_v40 = vsel %vm586_vm1, %v953_v27, 0  ;;  %v2413_v8 = vpop.f32.mrb[6].mxu1  ;;  %v2415_v9 = vpop.f32.mrb[7].mxu0  ;;  %vm1189_vm13 = vmpackc.low %vm1186_vm10, %vm1185_vm9 }
 0x299   : > { %v2417_v10 = vpop.f32.mrb[7].mxu1  ;;  %v1191_v18 = vsel %vm1189_vm13, 65537, %v2003_v6 }
 0x29a   : > { %966 = vrot.lane.b32.xlu1 %v958_v28, %s2004_s22  ;;  %v1196_v19 = vrot.slane %v1191_v18, %v2162_v14  ;;  %v1200_v20 = vrot.slane %v1191_v18, %v2167_v16 }
 0x29b   : > { %968 = vrot.lane.b32.xlu0 %v959_v30, %s2004_s22 }
 0x29e   : > { %970 = vrot.lane.b32.xlu1 %v960_v31, %s2004_s22 }
 0x29f   : > { %972 = vrot.lane.b32.xlu0 %v961_v35, %s2004_s22  ;;  %s1776_s22 = sshll.u32 %s465_s26, 4  ;;  %s2669_s22 = int_to_ptr.vmem [resolvable:$true] %s1776_s22 }
 0x2a0   : > { %p1946_p2 = scmp.lt.s32.totalorder %s2669_s22, %s1944_s0 }
 0x2a2   : > { %986 = vrot.lane.b32.xlu1 %v952_v26, %s2005_s23 }
 0x2a3   : > { %988 = vrot.lane.b32.xlu0 %v953_v27, %s2005_s23 }
 0x2a6   : > { %1016 = vrot.lane.b32.xlu1 %v954_v37, %s2006_s24 }
 0x2a7   : > { %1018 = vrot.lane.b32.xlu0 %v955_v38, %s2006_s24  ;;  %v1936_v38 = vld [vmem:[%s2714_s3] sm:$0xff]  }
 0x2aa   : > { %1020 = vrot.lane.b32.xlu1 %v956_v33, %s2006_s24 }
 0x2ab   : > { %1022 = vrot.lane.b32.xlu0 %v957_v40, %s2006_s24 }
 0x308   : > { %v983_v36 = vpop.permute.xlu1 %982 }
 0x309   : > { %v985_v39 = vpop.permute.xlu0 %984 }
 0x30a   : > { %v990_v41 = vsel %vm579_vm2, %v983_v36, %v985_v39 }
 0x30b   : > { %1036 = vrot.lane.b32.xlu0 %v990_v41, %s2006_s24 }
 0x30c   : > { %v967_v42 = vpop.permute.xlu1 %966 }
 0x30d   : > { %v969_v44 = vpop.permute.xlu0 %968  ;;  %v974_v46 = vsel %vm623_vm12, %v2259_v48, %v967_v42 }
 0x30e   : > { %1024 = vrot.lane.b32.xlu1 %v974_v46, %s2006_s24  ;;  %v975_v53 = vsel %vm623_vm12, %v967_v42, %v969_v44 }
 0x30f   : > { %1034 = vrot.lane.b32.xlu0 %v983_v36, %s2006_s24 }
 0x310   : > { %v971_v47 = vpop.permute.xlu1 %970 }
 0x311   : > { %v973_v49 = vpop.permute.xlu0 %972  ;;  %v976_v50 = vsel %vm623_vm12, %v969_v44, %v971_v47 }
 0x312   : > { %1032 = vrot.lane.b32.xlu1 %v973_v49, %s2006_s24  ;;  %v977_v48 = vsel %vm623_vm12, %v971_v47, %v973_v49  ;;  %vm1188_vm12 = vcmp.ge.s32.totalorder %v2160_v13, 4 }
 0x313   : > { %1028 = vrot.lane.b32.xlu0 %v976_v50, %s2006_s24  ;;  %vm1190_vm14 = vmpackc.low %vm1188_vm12, %vm1187_vm11  ;;  %vm1319_vm12 = vcmask 31744  }
 0x314   : > { %v987_v51 = vpop.permute.xlu1 %986  ;;  %v1192_v21 = vsel %vm1190_vm14, 65537, %v2003_v6 }
 0x315   : > { %v989_v52 = vpop.permute.xlu0 %988  ;;  %v991_v32 = vsel %vm579_vm2, %v985_v39, %v987_v51  ;;  %v1204_v7 = vrot.slane %v1192_v21, %v2162_v14  ;;  %v1208_v12 = vrot.slane %v1192_v21, %v2167_v16 }
 0x316   : > { %1026 = vrot.lane.b32.xlu1 %v975_v53, %s2006_s24  ;;  %v992_v59 = vsel %vm579_vm2, %v987_v51, %v989_v52 }
 0x317   : > { %1030 = vrot.lane.b32.xlu0 %v977_v48, %s2006_s24 }
 0x318   : > { %v1017_v54 = vpop.permute.xlu1 %1016 }
 0x319   : > { %v1019_v29 = vpop.permute.xlu0 %1018  ;;  %v1044_v43 = vsel %vm718_vm6, %v2310_v11, %v1017_v54 }
 0x31a   : > { %1038 = vrot.lane.b32.xlu1 %v991_v32, %s2006_s24  ;;  %v1045_v34 = vsel %vm718_vm6, %v1017_v54, %v1019_v29 }
 0x31b   : > { %1042 = vrot.lane.b32.xlu0 %v989_v52, %s2006_s24  ;;  %1071 = vmatprep.subr.bf16.mxu0 %v1045_v34 }
 0x31c   : > { %1072 = vmatpush1.bf16.msra.mxu0 %v1044_v43  ;;  %v1021_v55 = vpop.permute.xlu1 %1020 }
 0x31d   : > { %v1023_v58 = vpop.permute.xlu0 %1022  ;;  %v1046_v11 = vsel %vm718_vm6, %v1019_v29, %v1021_v55 }
 0x31e   : > { %1040 = vrot.lane.b32.xlu1 %v992_v59, %s2006_s24  ;;  %v1047_v62 = vsel %vm718_vm6, %v1021_v55, %v1023_v58 }
 0x31f   : > { %1004 = vperm.xlu0 %1926, %v996_v57   ;;  %1114 = vmatprep.subr.bf16.mxu1 %v1047_v62 }
 0x320   : > { %1115 = vmatpush1.bf16.msra.mxu1 %v1046_v11 }
 0x322   : > { %999 = vperm.xlu1 %1927, %v995_v1  }
 0x323   : > { %852 = vperm.xlu0 %1926, %v844_v4  }
 0x326   : > { %847 = vperm.xlu1 %1927, %v843_v17  }
 0x327   : > { %1211 = vrot.lane.b32.xlu0 %v1200_v20, %s2007_s21 }
 0x32a   : > { %1209 = vrot.lane.b32.xlu1 %v1196_v19, %s2007_s21 }
 0x32b   : > { %1215 = vrot.lane.b32.xlu0 %v1208_v12, %s2007_s21 }
 0x32e   : > { %1213 = vrot.lane.b32.xlu1 %v1204_v7, %s2007_s21 }
 0x32f   : > { %1237 = vrot.lane.b32.xlu0 %v2003_v6, %s2005_s23 }
 0x37d   : > { %v1037_v13 = vpop.permute.xlu0 %1036 }
 0x380   : > { %v1025_v15 = vpop.permute.xlu1 %1024 }
 0x381   : > { %v1035_v22 = vpop.permute.xlu0 %1034 }
 0x382   : > { %v1052_v37 = vsel %vm718_vm6, %v1035_v22, %v1037_v13 }
 0x384   : > { %v1033_v23 = vpop.permute.xlu1 %1032 }
 0x385   : > { %v1029_v24 = vpop.permute.xlu0 %1028 }
 0x388   : > { %v1027_v25 = vpop.permute.xlu1 %1026 }
 0x389   : > { %v1048_v26 = vsel %vm718_vm6, %v1025_v15, %v1027_v25  ;;  %v1031_v27 = vpop.permute.xlu0 %1030  ;;  %v1049_v28 = vsel %vm718_vm6, %v1027_v25, %v1029_v24 }
 0x38a   : > { %v1050_v16 = vsel %vm718_vm6, %v1029_v24, %v1031_v27  ;;  %1073 = vmatprep.subr.bf16.mxu0 %v1049_v28  ;;  %v1051_v30 = vsel %vm718_vm6, %v1031_v27, %v1033_v23 }
 0x38b   : > { %1074 = vmatpush1.bf16.msra.mxu0 %v1048_v26  ;;  %1116 = vmatprep.subr.bf16.mxu1 %v1051_v30 }
 0x38c   : > { %1117 = vmatpush1.bf16.msra.mxu1 %v1050_v16  ;;  %v1039_v31 = vpop.permute.xlu1 %1038 }
 0x38d   : > { %v1053_v35 = vsel %vm718_vm6, %v1037_v13, %v1039_v31  ;;  %v1043_v33 = vpop.permute.xlu0 %1042 }
 0x38e   : > { %1075 = vmatprep.subr.bf16.mxu0 %v1053_v35 }
 0x38f   : > { %1076 = vmatpush1.bf16.msra.mxu0 %v1052_v37 }
 0x390   : > { %v1041_v40 = vpop.permute.xlu1 %1040 }
 0x391   : > { %v1054_v36 = vsel %vm718_vm6, %v1039_v31, %v1041_v40  ;;  %v1055_v39 = vsel %vm718_vm6, %v1041_v40, %v1043_v33 }
 0x392   : > { %1856 = vmatmul.mubr.msk.bf16.vlgmr.msra.gmra.mrb[8].mxu0 %vm743_vm7, %v1936_v38  ;;  %1118 = vmatprep.subr.bf16.mxu1 %v1055_v39 }
 0x393   : > { %1119 = vmatpush1.bf16.msra.mxu1 %v1054_v36  ;;  %1379 = vmatprep.mubr.bf16.mxu0 %v2003_v6 }
 0x396   : > { %1857 = vmatmul.mubr.msk.bf16.vlgmr.msra.gmra.mrb[8].mxu1 %vm743_vm7, %v1936_v38 }
 0x397   : > { %1422 = vmatprep.mubr.bf16.mxu1 %v2003_v6 }
 0x39e   : > { %v1005_v41 = vpop.permute.xlu0 %1004 }
 0x3a1   : > { %v1000_v42 = vpop.permute.xlu1 %999 }
 0x3a2   : > { %v853_v44 = vpop.permute.xlu0 %852 }
 0x3a3   : > { %v903_v54 = vadd.f32 %v2411_v5, %v853_v44  ;;  %v905_v55 = vadd.f32 %v2415_v9, %v853_v44  ;;  %v946_v4 = vadd.f32 %v2413_v8, %v853_v44  ;;  %v948_v5 = vadd.f32 %v2417_v10, %v853_v44 }
 0x3a5   : > { %v848_v46 = vpop.permute.xlu1 %847 }
 0x3a6   : > { %v899_v53 = vadd.f32 %v2396_v63, %v848_v46  ;;  %v901_v34 = vadd.f32 %v2404_v2, %v848_v46  ;;  %v942_v2 = vadd.f32 %v2398_v0, %v848_v46  ;;  %v944_v13 = vadd.f32 %v2406_v3, %v848_v46  ;;  %v1212_v36 = vpop.permute.xlu0 %1211 }
 0x465   : > { %v1105_v47 = vpop.f32.mrb[8].mxu0 }
 0x466   : > { %v1106_v49 = vadd.f32 %v1105_v47, %v1000_v42  ;;  %v1107_v50 = vpop.f32.mrb[9].mxu0  ;;  %v2491_v47 = vpop.permute.xlu0 %1215 }
 0x467   : > { %v1108_v51 = vadd.f32 %v1107_v50, %v1000_v42  ;;  %v1109_v52 = vpop.f32.mrb[10].mxu0  ;;  %vm1224_vm9 = vcmp.ne.s16.totalorder %v2491_v47, 0 }
 0x468   : > { %v1157_v48 = vmax.f32 %v1106_v49, 0.0  ;;  %v1110_v29 = vadd.f32 %v1109_v52, %v1005_v41  ;;  %v1111_v32 = vpop.f32.mrb[11].mxu0 }
 0x469   : > { %v1158_v43 = vmax.f32 %v1108_v51, 0.0  ;;  %v1112_v57 = vadd.f32 %v1111_v32, %v1005_v41  ;;  %v1148_v58 = vpop.f32.mrb[8].mxu1 }
 0x46a   : > { %v1165_v59 = vadd.f32 %v1157_v48, %v899_v53  ;;  %v1161_v62 = vmax.f32 %v1110_v29, 0.0  ;;  %v1149_v11 = vadd.f32 %v1148_v58, %v1000_v42  ;;  %v1150_v1 = vpop.f32.mrb[9].mxu1  ;;  %v2527_v32 = vpop.permute.xlu0 %1237 }
 0x46b   : > { %v1166_v17 = vadd.f32 %v1158_v43, %v901_v34  ;;  %v1162_v63 = vmax.f32 %v1112_v57, 0.0  ;;  %v1151_v18 = vadd.f32 %v1150_v1, %v1000_v42  ;;  %v1152_v19 = vpop.f32.mrb[10].mxu1  ;;  %v1210_v42 = vpop.permute.xlu1 %1209 }
 0x46c   : > { %v1169_v20 = vadd.f32 %v1161_v62, %v903_v54  ;;  %v1159_v21 = vmax.f32 %v1149_v11, 0.0  ;;  %v1153_v7 = vadd.f32 %v1152_v19, %v1005_v41  ;;  %v1154_v9 = vpop.f32.mrb[11].mxu1  ;;  %v1173_v23 = vmax.f32 %v1165_v59, 0.0 }
 0x46d   : > { %v1170_v12 = vadd.f32 %v1162_v63, %v905_v55  ;;  %v1160_v15 = vmax.f32 %v1151_v18, 0.0  ;;  %v1155_v22 = vadd.f32 %v1154_v9, %v1005_v41  ;;  %v1174_v26 = vmax.f32 %v1166_v17, 0.0 }
 0x46e   : > { %v1177_v24 = vmax.f32 %v1169_v20, 0.0  ;;  %v1167_v8 = vadd.f32 %v1159_v21, %v942_v2  ;;  %v1163_v25 = vmax.f32 %v1153_v7, 0.0  ;;  %v2483_v46 = vsel %vm1217_vm15, %v1210_v42, %v1212_v36 }
 0x46f   : > { %v1178_v27 = vmax.f32 %v1170_v12, 0.0  ;;  %v1168_v28 = vadd.f32 %v1160_v15, %v944_v13  ;;  %v1164_v16 = vmax.f32 %v1155_v22, 0.0  ;;  %vm1221_vm0 = vcmp.ne.s16.totalorder %v2483_v46, 0  ;;  %v1214_v51 = vpop.permute.xlu1 %1213 }
 0x470   : > { %v2461_v10 = vpack.c.bf16 %v1177_v24, %v1173_v23  ;;  %v1171_v30 = vadd.f32 %v1163_v25, %v946_v4  ;;  %v1175_v35 = vmax.f32 %v1167_v8, 0.0  ;;  %v2503_v52 = vsel %vm1217_vm15, %v1214_v51, %v2491_v47  ;;  %v1268_v23 = vld [vmem:[%s2719_s8] sm:$0xff]  ;;  %v1269_v24 = vld [vmem:[%s2719_s8 + $0x8] sm:$0xff] }
 0x471   : > { %v2463_v0 = vpack.c.bf16 %v1178_v27, %v1174_v26  ;;  %v1172_v31 = vadd.f32 %v1164_v16, %v948_v5  ;;  %v1176_v38 = vmax.f32 %v1168_v28, 0.0  ;;  %vm1223_vm10 = vcmp.ne.s16.totalorder %v2503_v52, 0 }
 0x472   : > { %v1179_v37 = vmax.f32 %v1171_v30, 0.0  ;;  %1255 = vrot.lane.b32.xlu0 %v2461_v10, %s2007_s21  ;;  %v1229_v3 = vsel %vm583_vm4, %v2461_v10, 0  ;;  %v1225_v49 = vsel %vm1221_vm0, %v2461_v10, 0  ;;  %v2512_v53 = vsel %vm1217_vm15, %v1212_v36, %v1214_v51 }
 0x473   : > { %v1180_v33 = vmax.f32 %v1172_v31, 0.0  ;;  %1239 = vrot.lane.b32.xlu1 %v1229_v3, %s2005_s23  ;;  %v1230_v41 = vsel %vm584_vm3, %v2463_v0, 0  ;;  %vm1222_vm11 = vcmp.ne.s16.totalorder %v2512_v53, 0 }
 0x474   : > { %v2471_v40 = vpack.c.bf16 %v1179_v37, %v1175_v35  ;;  %v1226_v29 = vsel %vm1222_vm11, %v2463_v0, 0 }
 0x475   : > { %v2473_v39 = vpack.c.bf16 %v1180_v33, %v1176_v38 }
 0x476   : > { %1241 = vrot.lane.b32.xlu0 %v1230_v41, %s2005_s23  ;;  %v1231_v44 = vsel %vm585_vm5, %v2471_v40, 0  ;;  %v1227_v54 = vsel %vm1223_vm10, %v2471_v40, 0  ;;  %v1937_v41 = vld [vmem:[%s2718_s7] sm:$0xff]  }
 0x477   : > { %1243 = vrot.lane.b32.xlu1 %v1231_v44, %s2005_s23  ;;  %v1232_v50 = vsel %vm586_vm1, %v2473_v39, 0  ;;  %v1228_v48 = vsel %vm1224_vm9, %v2473_v39, 0 }
 0x47a   : > { %1259 = vrot.lane.b32.xlu0 %v2471_v40, %s2007_s21 }
 0x47b   : > { %1257 = vrot.lane.b32.xlu1 %v2463_v0, %s2007_s21 }
 0x47e   : > { %1291 = vrot.lane.b32.xlu0 %v1225_v49, %s2008_s14 }
 0x47f   : > { %1245 = vrot.lane.b32.xlu1 %v1232_v50, %s2005_s23 }
 0x482   : > { %1289 = vrot.lane.b32.xlu0 %v2003_v6, %s2008_s14 }
 0x483   : > { %1261 = vrot.lane.b32.xlu1 %v2473_v39, %s2007_s21 }
 0x486   : > { %1297 = vrot.lane.b32.xlu0 %v1228_v48, %s2008_s14 }
 0x487   : > { %1295 = vrot.lane.b32.xlu1 %v1227_v54, %s2008_s14 }
 0x48b   : > { %1293 = vrot.lane.b32.xlu1 %v1226_v29, %s2008_s14 }
 0x4e4   : > { %v1256_v34 = vpop.permute.xlu0 %1255 }
 0x4e5   : > { %v1240_v43 = vpop.permute.xlu1 %1239 }
 0x4e6   : > { %v1247_v55 = vsel %vm579_vm2, %v2527_v32, %v1240_v43 }
 0x4e7   : > { %1299 = vrot.lane.b32.xlu1 %v1247_v55, %s2008_s14 }
 0x4e8   : > { %v1242_v57 = vpop.permute.xlu0 %1241 }
 0x4e9   : > { %v1244_v58 = vpop.permute.xlu1 %1243  ;;  %v1248_v18 = vsel %vm579_vm2, %v1240_v43, %v1242_v57 }
 0x4ea   : > { %v1249_v19 = vsel %vm579_vm2, %v1242_v57, %v1244_v58 }
 0x4ec   : > { %v1260_v59 = vpop.permute.xlu0 %1259 }
 0x4ed   : > { %v1258_v62 = vpop.permute.xlu1 %1257 }
 0x4ee   : > { %v1263_v11 = vsel %vm1217_vm15, %v1256_v34, %v1258_v62  ;;  %v1264_v2 = vsel %vm1217_vm15, %v1258_v62, %v1260_v59 }
 0x4ef   : > { %1311 = vrot.lane.b32.xlu0 %v1263_v11, %s2008_s14 }
 0x4f0   : > { %v1292_v1 = vpop.permute.xlu0 %1291 }
 0x4f1   : > { %v1246_v4 = vpop.permute.xlu1 %1245 }
 0x4f2   : > { %1307 = vrot.lane.b32.xlu1 %v1246_v4, %s2008_s14  ;;  %v1250_v21 = vsel %vm579_vm2, %v1244_v58, %v1246_v4 }
 0x4f3   : > { %1309 = vrot.lane.b32.xlu0 %v1256_v34, %s2008_s14 }
 0x4f4   : > { %v2536_v17 = vpop.permute.xlu0 %1289 }
 0x4f5   : > { %v1262_v63 = vpop.permute.xlu1 %1261  ;;  %v1320_v22 = vsel %vm1319_vm12, %v2536_v17, %v1292_v1 }
 0x4f6   : > { %1301 = vrot.lane.b32.xlu1 %v1248_v18, %s2008_s14  ;;  %v1265_v12 = vsel %vm1217_vm15, %v1260_v59, %v1262_v63 }
 0x4f7   : > { %1303 = vrot.lane.b32.xlu0 %v1249_v19, %s2008_s14 }
 0x4f8   : > { %v1298_v5 = vpop.permute.xlu0 %1297 }
 0x4f9   : > { %v1296_v20 = vpop.permute.xlu1 %1295 }
 0x4fa   : > { %1313 = vrot.lane.b32.xlu1 %v1264_v2, %s2008_s14  ;;  %v1323_v7 = vsel %vm1319_vm12, %v1296_v20, %v1298_v5 }
 0x4fb   : > { %1305 = vrot.lane.b32.xlu0 %v1250_v21, %s2008_s14  ;;  %1390 = vmatprep.subr.bf16.mxu1 %v1323_v7 }
 0x4fd   : > { %v1294_v9 = vpop.permute.xlu1 %1293 }
 0x4fe   : > { %v1322_v13 = vsel %vm1319_vm12, %v1294_v9, %v1296_v20  ;;  %1315 = vrot.lane.b32.xlu1 %v1265_v12, %s2008_s14  ;;  %v1321_v15 = vsel %vm1319_vm12, %v1292_v1, %v1294_v9 }
 0x4ff   : > { %1317 = vrot.lane.b32.xlu0 %v1262_v63, %s2008_s14  ;;  %1347 = vmatprep.subr.bf16.mxu0 %v1321_v15 }
 0x500   : > { %1391 = vmatpush1.bf16.msra.mxu1 %v1322_v13  ;;  %1348 = vmatpush1.bf16.msra.mxu0 %v1320_v22 }
 0x502   : > { %1272 = vperm.xlu1 %1927, %v1268_v23  }
 0x503   : > { %1277 = vperm.xlu0 %1926, %v1269_v24  }
 0x559   : > { %v1300_v8 = vpop.permute.xlu1 %1299 }
 0x561   : > { %v1312_v25 = vpop.permute.xlu0 %1311 }
 0x564   : > { %v1308_v26 = vpop.permute.xlu1 %1307 }
 0x565   : > { %v1310_v27 = vpop.permute.xlu0 %1309 }
 0x566   : > { %v1328_v36 = vsel %vm1319_vm12, %v1310_v27, %v1312_v25 }
 0x568   : > { %v1302_v28 = vpop.permute.xlu1 %1301 }
 0x569   : > { %v1304_v16 = vpop.permute.xlu0 %1303  ;;  %v1324_v31 = vsel %vm1319_vm12, %v1300_v8, %v1302_v28 }
 0x56a   : > { %v1325_v30 = vsel %vm1319_vm12, %v1302_v28, %v1304_v16 }
 0x56b   : > { %1349 = vmatprep.subr.bf16.mxu0 %v1325_v30 }
 0x56c   : > { %1350 = vmatpush1.bf16.msra.mxu0 %v1324_v31  ;;  %v1314_v35 = vpop.permute.xlu1 %1313 }
 0x56d   : > { %v1306_v37 = vpop.permute.xlu0 %1305  ;;  %v1329_v3 = vsel %vm1319_vm12, %v1312_v25, %v1314_v35 }
 0x56e   : > { %v1326_v38 = vsel %vm1319_vm12, %v1304_v16, %v1306_v37  ;;  %1351 = vmatprep.subr.bf16.mxu0 %v1329_v3  ;;  %v1327_v33 = vsel %vm1319_vm12, %v1306_v37, %v1308_v26 }
 0x56f   : > { %1392 = vmatprep.subr.bf16.mxu1 %v1327_v33 }
 0x570   : > { %1352 = vmatpush1.bf16.msra.mxu0 %v1328_v36  ;;  %1393 = vmatpush1.bf16.msra.mxu1 %v1326_v38  ;;  %v1316_v42 = vpop.permute.xlu1 %1315 }
 0x571   : > { %v1318_v44 = vpop.permute.xlu0 %1317  ;;  %v1330_v50 = vsel %vm1319_vm12, %v1314_v35, %v1316_v42 }
 0x572   : > { %v1331_v49 = vsel %vm1319_vm12, %v1316_v42, %v1318_v44 }
 0x573   : > { %1859 = vmatmul.mubr.msk.bf16.vlgmr.msra.gmra.mrb[12].mxu0 %vm743_vm7, %v1937_v41  ;;  %1394 = vmatprep.subr.bf16.mxu1 %v1331_v49 }
 0x574   : > { %1395 = vmatpush1.bf16.msra.mxu1 %v1330_v50  ;;  %1602 = vmatprep.mubr.bf16.mxu0 %v2003_v6  ;;  %v1495_v50 = vld [vmem:[%s2721_s10 + $0x8] sm:$0xff] }
 0x577   : > { %1860 = vmatmul.mubr.msk.bf16.vlgmr.msra.gmra.mrb[12].mxu1 %vm743_vm7, %v1937_v41 }
 0x578   : > { %1645 = vmatprep.mubr.bf16.mxu1 %v2003_v6 }
 0x581   : > { %v1273_v51 = vpop.permute.xlu1 %1272 }
 0x582   : > { %v1278_v34 = vpop.permute.xlu0 %1277 }
 0x646   : > { %v1381_v48 = vpop.f32.mrb[12].mxu0 }
 0x647   : > { %v1382_v54 = vadd.f32 %v1381_v48, %v1273_v51  ;;  %v1383_v29 = vpop.f32.mrb[13].mxu0 }
 0x648   : > { %v1384_v43 = vadd.f32 %v1383_v29, %v1273_v51  ;;  %v1385_v55 = vpop.f32.mrb[14].mxu0 }
 0x649   : > { %v1386_v57 = vadd.f32 %v1385_v55, %v1278_v34  ;;  %v1387_v58 = vpop.f32.mrb[15].mxu0  ;;  %v1433_v11 = vmax.f32 %v1382_v54, 0.0 }
 0x64a   : > { %v1388_v59 = vadd.f32 %v1387_v58, %v1278_v34  ;;  %v1424_v62 = vpop.f32.mrb[12].mxu1  ;;  %v1434_v18 = vmax.f32 %v1384_v43, 0.0 }
 0x64b   : > { %v1437_v1 = vmax.f32 %v1386_v57, 0.0  ;;  %v1425_v4 = vadd.f32 %v1424_v62, %v1273_v51  ;;  %v1426_v63 = vpop.f32.mrb[13].mxu1 }
 0x64c   : > { %v1438_v19 = vmax.f32 %v1388_v59, 0.0  ;;  %v1427_v5 = vadd.f32 %v1426_v63, %v1273_v51  ;;  %v1428_v20 = vpop.f32.mrb[14].mxu1 }
 0x64d   : > { %v1449_v6 = vpack.c.bf16 %v1437_v1, %v1433_v11  ;;  %v1429_v2 = vadd.f32 %v1428_v20, %v1278_v34  ;;  %v1430_v21 = vpop.f32.mrb[15].mxu1  ;;  %v1435_v12 = vmax.f32 %v1425_v4, 0.0  ;;  %v1938_v20 = vld [vmem:[%s2720_s9] sm:$0xff]  }
 0x64e   : > { %v1450_v7 = vpack.c.bf16 %v1438_v19, %v1434_v18  ;;  %v1431_v9 = vadd.f32 %v1430_v21, %v1278_v34  ;;  %v1436_v15 = vmax.f32 %v1427_v5, 0.0 }
 0x64f   : > { %v1439_v13 = vmax.f32 %v1429_v2, 0.0  ;;  %1481 = vrot.lane.b32.xlu1 %v1449_v6, %s2007_s21  ;;  %v1457_v8 = vsel %vm583_vm4, %v1449_v6, 0  ;;  %v1453_v56 = vsel %vm1221_vm0, %v1449_v6, 0  ;;  %vm1761_vm4 = vcmask 24576  }
 0x650   : > { %v1440_v22 = vmax.f32 %v1431_v9, 0.0  ;;  %1483 = vrot.lane.b32.xlu0 %v1450_v7, %s2007_s21  ;;  %v1458_v25 = vsel %vm584_vm3, %v1450_v7, 0  ;;  %v1454_v60 = vsel %vm1222_vm11, %v1450_v7, 0  ;;  %vm1703_vm3 = vcmask 23552  }
 0x651   : > { %v1451_v23 = vpack.c.bf16 %v1439_v13, %v1435_v12 }
 0x652   : > { %v1452_v24 = vpack.c.bf16 %v1440_v22, %v1436_v15 }
 0x653   : > { %1465 = vrot.lane.b32.xlu1 %v1457_v8, %s2005_s23  ;;  %v1459_v26 = vsel %vm585_vm5, %v1451_v23, 0  ;;  %v1455_v45 = vsel %vm1223_vm10, %v1451_v23, 0 }
 0x654   : > { %1467 = vrot.lane.b32.xlu0 %v1458_v25, %s2005_s23  ;;  %v1460_v27 = vsel %vm586_vm1, %v1452_v24, 0  ;;  %v1456_v61 = vsel %vm1224_vm9, %v1452_v24, 0  ;;  %vm2010_vm1 = vmmov 0  }
 0x657   : > { %1469 = vrot.lane.b32.xlu1 %v1459_v26, %s2005_s23 }
 0x658   : > { %1471 = vrot.lane.b32.xlu0 %v1460_v27, %s2005_s23  ;;  %v1445_v27 = vunpack.c.h.bf16 %v2461_v10  ;;  %s2011_s23 = smov 1  }
 0x65b   : > { %1485 = vrot.lane.b32.xlu1 %v1451_v23, %s2007_s21  ;;  %v1441_v23 = vunpack.c.l.bf16 %v2461_v10  ;;  %v2009_v10 = vmov 0.0  }
 0x65c   : > { %1487 = vrot.lane.b32.xlu0 %v1452_v24, %s2007_s21  ;;  %v1442_v24 = vunpack.c.l.bf16 %v2463_v0  ;;  %s2012_s21 = smov 3  }
 0x65f   : > { %1515 = vrot.lane.b32.xlu1 %v1453_v56, %s2008_s14 }
 0x660   : > { %1517 = vrot.lane.b32.xlu0 %v1454_v60, %s2008_s14  ;;  %v1446_v60 = vunpack.c.h.bf16 %v2463_v0 }
 0x663   : > { %1519 = vrot.lane.b32.xlu1 %v1455_v45, %s2008_s14 }
 0x664   : > { %1521 = vrot.lane.b32.xlu0 %v1456_v61, %s2008_s14 }
 0x6c1   : > { %v1482_v28 = vpop.permute.xlu1 %1481 }
 0x6c2   : > { %v1484_v46 = vpop.permute.xlu0 %1483 }
 0x6c3   : > { %v1489_v16 = vsel %vm1217_vm15, %v1482_v28, %v1484_v46 }
 0x6c4   : > { %1535 = vrot.lane.b32.xlu0 %v1489_v16, %s2008_s14 }
 0x6c5   : > { %v1466_v53 = vpop.permute.xlu1 %1465 }
 0x6c6   : > { %v1473_v30 = vsel %vm579_vm2, %v2527_v32, %v1466_v53  ;;  %v1468_v31 = vpop.permute.xlu0 %1467 }
 0x6c7   : > { %1523 = vrot.lane.b32.xlu1 %v1473_v30, %s2008_s14  ;;  %v1474_v3 = vsel %vm579_vm2, %v1466_v53, %v1468_v31  ;;  %v1447_v53 = vunpack.c.h.bf16 %v2471_v40 }
 0x6c8   : > { %1533 = vrot.lane.b32.xlu0 %v1482_v28, %s2008_s14 }
 0x6c9   : > { %v1470_v52 = vpop.permute.xlu1 %1469 }
 0x6ca   : > { %v1475_v47 = vsel %vm579_vm2, %v1468_v31, %v1470_v52  ;;  %v1472_v35 = vpop.permute.xlu0 %1471 }
 0x6cb   : > { %1531 = vrot.lane.b32.xlu1 %v1472_v35, %s2008_s14  ;;  %v1476_v33 = vsel %vm579_vm2, %v1470_v52, %v1472_v35  ;;  %vm1696_vm2 = vcmask 7168  }
 0x6cc   : > { %1527 = vrot.lane.b32.xlu0 %v1475_v47, %s2008_s14 }
 0x6cd   : > { %v1486_v37 = vpop.permute.xlu1 %1485 }
 0x6ce   : > { %v1488_v38 = vpop.permute.xlu0 %1487  ;;  %v1490_v36 = vsel %vm1217_vm15, %v1484_v46, %v1486_v37  ;;  %v1443_v46 = vunpack.c.l.bf16 %v2471_v40 }
 0x6cf   : > { %1525 = vrot.lane.b32.xlu1 %v1474_v3, %s2008_s14  ;;  %v1491_v51 = vsel %vm1217_vm15, %v1486_v37, %v1488_v38 }
 0x6d0   : > { %1529 = vrot.lane.b32.xlu0 %v1476_v33, %s2008_s14 }
 0x6d1   : > { %v1516_v32 = vpop.permute.xlu1 %1515 }
 0x6d2   : > { %v1518_v41 = vpop.permute.xlu0 %1517  ;;  %v1543_v44 = vsel %vm1319_vm12, %v2536_v17, %v1516_v32  ;;  %v1494_v17 = vld [vmem:[%s2721_s10] sm:$0xff] }
 0x6d3   : > { %1537 = vrot.lane.b32.xlu1 %v1490_v36, %s2008_s14  ;;  %v1544_v42 = vsel %vm1319_vm12, %v1516_v32, %v1518_v41  ;;  %v1444_v32 = vunpack.c.l.bf16 %v2473_v39 }
 0x6d4   : > { %1541 = vrot.lane.b32.xlu0 %v1488_v38, %s2008_s14  ;;  %1570 = vmatprep.subr.bf16.mxu0 %v1544_v42 }
 0x6d5   : > { %1571 = vmatpush1.bf16.msra.mxu0 %v1543_v44  ;;  %v1520_v49 = vpop.permute.xlu1 %1519  ;;  %v1448_v44 = vunpack.c.h.bf16 %v2473_v39 }
 0x6d6   : > { %v1522_v48 = vpop.permute.xlu0 %1521  ;;  %v1545_v29 = vsel %vm1319_vm12, %v1518_v41, %v1520_v49 }
 0x6d7   : > { %1539 = vrot.lane.b32.xlu1 %v1491_v51, %s2008_s14  ;;  %v1546_v54 = vsel %vm1319_vm12, %v1520_v49, %v1522_v48 }
 0x6d8   : > { %1503 = vperm.xlu0 %1926, %v1495_v50   ;;  %1613 = vmatprep.subr.bf16.mxu1 %v1546_v54 }
 0x6d9   : > { %1614 = vmatpush1.bf16.msra.mxu1 %v1545_v29 }
 0x6db   : > { %1498 = vperm.xlu1 %1927, %v1494_v17  }
 0x736   : > { %v1536_v34 = vpop.permute.xlu0 %1535 }
 0x739   : > { %v1524_v43 = vpop.permute.xlu1 %1523 }
 0x73a   : > { %v1534_v55 = vpop.permute.xlu0 %1533 }
 0x73b   : > { %v1551_v5 = vsel %vm1319_vm12, %v1534_v55, %v1536_v34 }
 0x73d   : > { %v1532_v57 = vpop.permute.xlu1 %1531 }
 0x73e   : > { %v1528_v58 = vpop.permute.xlu0 %1527 }
 0x741   : > { %v1526_v59 = vpop.permute.xlu1 %1525 }
 0x742   : > { %v1547_v62 = vsel %vm1319_vm12, %v1524_v43, %v1526_v59  ;;  %v1530_v11 = vpop.permute.xlu0 %1529  ;;  %v1548_v1 = vsel %vm1319_vm12, %v1526_v59, %v1528_v58 }
 0x743   : > { %v1549_v4 = vsel %vm1319_vm12, %v1528_v58, %v1530_v11  ;;  %1572 = vmatprep.subr.bf16.mxu0 %v1548_v1  ;;  %v1550_v63 = vsel %vm1319_vm12, %v1530_v11, %v1532_v57 }
 0x744   : > { %1573 = vmatpush1.bf16.msra.mxu0 %v1547_v62  ;;  %1615 = vmatprep.subr.bf16.mxu1 %v1550_v63 }
 0x745   : > { %1616 = vmatpush1.bf16.msra.mxu1 %v1549_v4  ;;  %v1538_v18 = vpop.permute.xlu1 %1537 }
 0x746   : > { %v1552_v19 = vsel %vm1319_vm12, %v1536_v34, %v1538_v18  ;;  %v1542_v6 = vpop.permute.xlu0 %1541 }
 0x747   : > { %1574 = vmatprep.subr.bf16.mxu0 %v1552_v19 }
 0x748   : > { %1575 = vmatpush1.bf16.msra.mxu0 %v1551_v5 }
 0x749   : > { %v1540_v2 = vpop.permute.xlu1 %1539  ;;  %1871 = vmatprep.subr.bf16.mxu0 %v2009_v10 }
 0x74a   : > { %v1553_v21 = vsel %vm1319_vm12, %v1538_v18, %v1540_v2  ;;  %v1554_v7 = vsel %vm1319_vm12, %v1540_v2, %v1542_v6  ;;  %v1708_v18 = vld [vmem:[#allocation2] sm:$0x1] }
 0x74b   : > { %1862 = vmatmul.mubr.msk.bf16.vlgmr.msra.gmra.mrb[16].mxu0 %vm743_vm7, %v1938_v20  ;;  %1617 = vmatprep.subr.bf16.mxu1 %v1554_v7 }
 0x74c   : > { %1618 = vmatpush1.bf16.msra.mxu1 %v1553_v21  ;;  %1873 = vmatprep.mubr.msk.bf16.mxu0 %vm2010_vm1, %v2009_v10 }
 0x74f   : > { %1863 = vmatmul.mubr.msk.bf16.vlgmr.msra.gmra.mrb[16].mxu1 %vm743_vm7, %v1938_v20 }
 0x757   : > { %v1504_v22 = vpop.permute.xlu0 %1503 }
 0x75a   : > { %v1499_v9 = vpop.permute.xlu1 %1498 }
 0x81e   : > { %v1604_v12 = vpop.f32.mrb[16].mxu0 }
 0x81f   : > { %v1605_v13 = vadd.f32 %v1604_v12, %v1499_v9  ;;  %v1606_v15 = vpop.f32.mrb[17].mxu0 }
 0x820   : > { %v1607_v8 = vadd.f32 %v1606_v15, %v1499_v9  ;;  %v1608_v25 = vpop.f32.mrb[18].mxu0 }
 0x821   : > { %v1656_v26 = vmax.f32 %v1605_v13, 0.0  ;;  %v1609_v56 = vadd.f32 %v1608_v25, %v1504_v22  ;;  %v1610_v45 = vpop.f32.mrb[19].mxu0 }
 0x822   : > { %v1657_v61 = vmax.f32 %v1607_v8, 0.0  ;;  %v1611_v28 = vadd.f32 %v1610_v45, %v1504_v22  ;;  %v1647_v16 = vpop.f32.mrb[16].mxu1 }
 0x823   : > { %v1664_v30 = vadd.f32 %v1656_v26, %v1441_v23  ;;  %v1660_v31 = vmax.f32 %v1609_v56, 0.0  ;;  %v1648_v52 = vadd.f32 %v1647_v16, %v1499_v9  ;;  %v1649_v47 = vpop.f32.mrb[17].mxu1 }
 0x824   : > { %v1665_v35 = vadd.f32 %v1657_v61, %v1442_v24  ;;  %v1661_v37 = vmax.f32 %v1611_v28, 0.0  ;;  %v1650_v3 = vadd.f32 %v1649_v47, %v1499_v9  ;;  %v1651_v38 = vpop.f32.mrb[18].mxu1  ;;  %v1707_v9 = vld [vmem:[%s2722_s11] sm:$0x1] }
 0x825   : > { %v1668_v33 = vadd.f32 %v1660_v31, %v1445_v27  ;;  %v1658_v0 = vmax.f32 %v1648_v52, 0.0  ;;  %v1652_v36 = vadd.f32 %v1651_v38, %v1504_v22  ;;  %v1653_v41 = vpop.f32.mrb[19].mxu1  ;;  %v1672_v50 = vmax.f32 %v1664_v30, 0.0 }
 0x826   : > { %v1669_v42 = vadd.f32 %v1661_v37, %v1446_v60  ;;  %v1659_v40 = vmax.f32 %v1650_v3, 0.0  ;;  %v1654_v49 = vadd.f32 %v1653_v41, %v1504_v22  ;;  %v1673_v29 = vmax.f32 %v1665_v35, 0.0 }
 0x827   : > { %v1676_v51 = vmax.f32 %v1668_v33, 0.0  ;;  %v1666_v48 = vadd.f32 %v1658_v0, %v1443_v46  ;;  %v1662_v54 = vmax.f32 %v1652_v36, 0.0 }
 0x828   : > { %v1677_v17 = vmax.f32 %v1669_v42, 0.0  ;;  %v1667_v34 = vadd.f32 %v1659_v40, %v1444_v32  ;;  %v1663_v43 = vmax.f32 %v1654_v49, 0.0 }
 0x829   : > { %v1680_v55 = vpack.c.bf16 %v1676_v51, %v1672_v50  ;;  %v1670_v57 = vadd.f32 %v1662_v54, %v1447_v53  ;;  %v1674_v62 = vmax.f32 %v1666_v48, 0.0 }
 0x82a   : > { %v1681_v58 = vpack.c.bf16 %v1677_v17, %v1673_v29  ;;  %v1671_v59 = vadd.f32 %v1663_v43, %v1448_v44  ;;  %v1675_v1 = vmax.f32 %v1667_v34, 0.0 }
 0x82b   : > { %v1678_v11 = vmax.f32 %v1670_v57, 0.0  ;;  %1685 = vrot.lane.b32.xlu1 %v1680_v55, %s2011_s23 }
 0x82c   : > { %v1679_v4 = vmax.f32 %v1671_v59, 0.0  ;;  %1688 = vrot.lane.b32.xlu0 %v1681_v58, %s2006_s24  ;;  %s1939_s24 = scalar_lea.vmem %s2669_s22, 16 }
 0x82d   : > { %v1682_v39 = vpack.c.bf16 %v1678_v11, %v1674_v62  ;;  %p1940_p13 = scmp.ne.s32.totalorder %s2669_s22, %s1939_s24  ;;  %p1947_p3 = scmp.lt.s32.totalorder %s1945_s17, %s1939_s24 }
 0x82e   : > { %v1683_v63 = vpack.c.bf16 %v1679_v4, %v1675_v1 }
 0x82f   : > { %1691 = vrot.lane.b32.xlu1 %v1682_v39, %s2012_s21  ;;  %p1941_p0 = pnand %p1940_p13, %p2125_p6  ;;  %p1948_p4 = por %p1947_p3, %p1946_p2 }
 0x830   : > { %1694 = vrot.lane.b32.xlu0 %v1683_v63, %s2008_s14  ;;  %s1865_s14 = sshll.u32 %s1836_s12, 4  ;;  %s1764_s12 = scalar_lea.sflag [#allocation5], %s2144_s16 }
 0x831   : > { %s2667_s21 = scalar_lea.hbm %s2724_s13, %s1865_s14  ;;  %p1942_p1 = pneg %p1941_p0 }
 0x833   : > { %1711 = vperm.xlu1 %1927, %v1708_v18   ;;  %p1949_p5 = pnand %p1948_p4, %p1942_p1 }
 0x89d   : > { %v1686_v19 = vpop.permute.xlu1 %1685 }
 0x89e   : > { %v1689_v5 = vpop.permute.xlu0 %1688 }
 0x89f   : > { %v1699_v20 = vsel %vm1696_vm2, %v1686_v19, %v1689_v5 }
 0x8a1   : > { %v1692_v6 = vpop.permute.xlu1 %1691 }
 0x8a2   : > { %v1702_v2 = vsel %vm718_vm6, %v1699_v20, %v1692_v6  ;;  %v1695_v21 = vpop.permute.xlu0 %1694 }
 0x8a3   : > { %v1705_v7 = vsel %vm1703_vm3, %v1702_v2, %v1695_v21 }
 0x8a4   : > { %1872 = vmatpush3.bf16.msra.mxu0 %v1705_v7 }
 0x8a7   : > { %1874 = vmatmul.mubr.msk.bf16.vlgmr.msra.gmra.mrb[20].mxu0 %vm860_vm8, %v1707_v9 }
 0x8b2   : > { %v1712_v12 = vpop.permute.xlu1 %1711 }
 0x8b3   : > { %v1717_v13 = vrot.slane %v1712_v12, %v2162_v14 }
 0x97a   : > { %v1755_v15 = vpop.f32.mrb[20].mxu0 }
 0x97b   : > { %v1756_v22 = vadd.f32 %v1755_v15, %v1717_v13  ;;  %v1875_v23 = vpop.f32.mrb[21].mxu0 }
 0x97c   : > { %v1758_v24 = vpop.f32.mrb[22].mxu0 }
 0x97d   : > { %v1876_v8 = vpop.f32.mrb[23].mxu0  ;;  %1762 = vst.msk [vmem:[%s465_s26] sm:$0x1] %vm1761_vm4, %v1756_v22 }
 0x97e   : > { %1952 = shalt.err (!%p1949_p5)
}
 0x97f   : > { %s1953_s16 = scalar_lea.hbm %s2667_s21, 16  ;;  %s1957_s23 = scalar_lea.hbm %s2724_s13, 32 }
 0x980   : > { %p1954_p7 = scmp.ne.s32.totalorder %s2667_s21, %s1953_s16  ;;  %p1958_p12 = scmp.lt.u32.totalorder %s2667_s21, %s2724_s13 }
 0x981   : > { %p1959_p13 = scmp.lt.u32.totalorder %s1957_s23, %s1953_s16  ;;  %p1961_p1 = scmp.lt.u32.totalorder %s1953_s16, %s2667_s21 }
 0x982   : > { %p1955_p10 = pnand %p1954_p7, %p2125_p6 }
 0x983   : > { %p1960_p0 = por %p1959_p13, %p1958_p12 }
 0x984   : > { %p1956_p11 = pneg %p1955_p10 }
 0x985   : > { %p1962_p2 = por %p1961_p1, %p1960_p0 }
 0x987   : > { %p1963_p3 = pnand %p1962_p2, %p1956_p11 }
 0x989   : > { %1966 = shalt.err (!%p1963_p3)
}
 0x98a   : > { %1877 = dma.vmem_to_hbm [thread:$0]  (%p2125_p6), %s2669_s22, 16, %s2667_s21, %s1764_s12  }
 0x98b PF: > { %s1788_s24 = sand.u32 1, %s1989_s27   ;;  %p1880_p4 = pnand %p1839_p9, %p2129_p8 }
 0x98c   : > { %s1789_s17 = scalar_lea.sflag [#allocation5], %s1788_s24 }
 0x98d   : > { %1984 = dma.done.wait (!%p1880_p4), %s1789_s17, 16  }
 0x98e   : > { %1986 = vsyncadd (!%p1880_p4), %s1789_s17, 4294967280  ;;  %p25_p5 = scmp.ge.s32.totalorder %s2110_s15, 4   ;;  %s2729_s27 = smov %s1993_s28 }
 0x98f   : > { %s2730_s28 = smov %s1997_s29  ;;  %s2731_s29 = smov %s2123_s18 }
 0x990   : > { %s2732_s30 = smov %s2110_s15  ;;  %27 = sbr.rel (!%p25_p5) target bundleno = 6 (0x6), region = 135 }
 0x997   :  { %1793 = vsyncpa [#allocation5], 1 }
 0x998   :  { %1795 = vsyncpa [#allocation5 + $0x1], 1 }

</bundles_post_ra>
